<compile_context>
chip_gen: v7x
topology: tpu7x:2x2x1
jax: 0.10.0
libtpu: 0.0.40
codegen_flags: <defaults>
</compile_context>

<pallas_src>
import functools

import jax
import jax.numpy as jnp
from jax.experimental import pallas as pl
from jax.experimental.pallas import tpu as pltpu

SELU_ALPHA = 1.6732632423543772
SELU_SCALE = 1.0507009873554805

BACKBONE_FEAT = 1000   # implied by head = nn.Linear(1064, .) with dense2 width 64
D1 = 326
D2 = 64
K_TILE_MAX = 2048      # max CHW contraction tile resident per grid step


def _round_up(x, m):
    return (x + m - 1) // m * m


def _chw_tiling(chw, k_tile_max=K_TILE_MAX):
    """Returns (padded CHW length, per-step contraction tile size)."""
    chw_pad = _round_up(chw, 128)
    if chw_pad <= k_tile_max:
        return chw_pad, chw_pad
    return _round_up(chw, k_tile_max), k_tile_max


def _selu(x):
    # Clamp the exp argument so the unselected positive branch does not produce inf.
    return SELU_SCALE * jnp.where(
        x > 0, x, SELU_ALPHA * (jnp.exp(jnp.minimum(x, 0.0)) - 1.0))


def custom_model_kernel(inv_hw,
                        img_ref, feat_ref,
                        pool_ref, wb_ref, bb_ref,
                        w1_ref, b1_ref, w2_ref, b2_ref,
                        wh1_ref, wh2_ref, bh_ref, aux_mask_ref,
                        out_ref,
                        pooled_acc):
    f32 = jnp.float32
    bf16 = jnp.bfloat16
    k = pl.program_id(1)
    k_last = pl.num_programs(1) - 1

    # ---- surrogate backbone: global avg-pool as a K-tiled MXU contraction ----
    # TODO(synk): full efficientnetv2_s conv stack not translated; surrogate used.
    @pl.when(k == 0)
    def _():
        pooled_acc[...] = jnp.zeros_like(pooled_acc)

    pooled_acc[...] += jnp.dot(img_ref[...].astype(bf16), pool_ref[...],
                               preferred_element_type=f32)          # (TB, C_pad)

    @pl.when(k == k_last)
    def _():
        pooled = pooled_acc[...] * inv_hw        # exact f32 1/HW scaling
        x1 = jnp.dot(pooled.astype(bf16), wb_ref[...],
                     preferred_element_type=f32) + bb_ref[...]      # (TB, 1024)
        # dropout_img: identity at inference

        # ---- feature branch --------------------------------------------------
        h = _selu(jnp.dot(feat_ref[...].astype(bf16), w1_ref[...],
                          preferred_element_type=f32) + b1_ref[...])  # (TB, 384)
        x2 = _selu(jnp.dot(h.astype(bf16), w2_ref[...],
                           preferred_element_type=f32) + b2_ref[...])  # (TB, 128)
        # dropout_feat: identity at inference

        # ---- fused head + aux_head (concat folded into packed split weights) -
        out = (jnp.dot(x1.astype(bf16), wh1_ref[...], preferred_element_type=f32)
               + jnp.dot(x2.astype(bf16), wh2_ref[...], preferred_element_type=f32)
               + bh_ref[...])                                        # (TB, NOUT_pad)

        # ReLU only on aux columns: relu(x) = x - min(x, 0); mask = 1.0 there.
        out_ref[...] = out - aux_mask_ref[...] * jnp.minimum(out, 0.0)


def init_params(key, in_channels, num_feature_cols, num_classes, aux_num_classes,
                hw):
    """PyTorch-Linear-style init U(-1/sqrt(fan_in), 1/sqrt(fan_in)); weights are
    packed (head|aux fused) and zero-padded to lane-friendly 128-multiples, then
    cast to bf16 for the MXU (biases stay f32)."""
    def linear(k, fan_in, fan_out):
        kw, kb = jax.random.split(k)
        bound = 1.0 / jnp.sqrt(float(fan_in))
        w = jax.random.uniform(kw, (fan_in, fan_out), jnp.float32, -bound, bound)
        b = jax.random.uniform(kb, (fan_out,), jnp.float32, -bound, bound)
        return w, b

    C, F = in_channels, num_feature_cols
    C_pad = _round_up(C, 128)
    F_pad = _round_up(F, 128)
    CHW_pad, K_TILE = _chw_tiling(C * hw)
    F1_pad = _round_up(BACKBONE_FEAT, 128)          # 1024
    D1_pad = _round_up(D1, 128)                     # 384
    D2_pad = _round_up(D2, 128)                     # 128
    NOUT_pad = _round_up(num_classes + aux_num_classes, 128)

    k = jax.random.split(key, 5)
    wb, bb = linear(k[0], C, BACKBONE_FEAT)              # surrogate backbone proj
    w1, b1 = linear(k[1], F, D1)                         # dense1
    w2, b2 = linear(k[2], D1, D2)                        # dense2
    wh, bh = linear(k[3], BACKBONE_FEAT + D2, num_classes)      # head
    wa, ba = linear(k[4], BACKBONE_FEAT + D2, aux_num_classes)  # aux_head

    def pad2(w, r, c):
        return jnp.zeros((r, c), jnp.float32).at[:w.shape[0], :w.shape[1]].set(w)

    def pad_row(b, c):
        return jnp.zeros((1, c), jnp.float32).at[0, :b.shape[0]].set(b)

    # Pooling matrix: block-diagonal 1.0 entries (bf16-exact); 1/HW is applied
    # in f32 inside the kernel.  Streamed over the CHW grid axis, never fully
    # resident in VMEM.
    pool = jnp.zeros((CHW_pad, C_pad), jnp.float32)
    pool = pool.at[:C * hw, :C].set(
        jnp.repeat(jnp.eye(C, dtype=jnp.float32), hw, axis=0))

    # Fuse heads: columns [0:NC) = head, [NC:NC+AUX) = aux; split by concat input.
    whf = jnp.concatenate([wh, wa], axis=1)              # (1064, NC+AUX)
    bhf = jnp.concatenate([bh, ba], axis=0)              # (NC+AUX,)
    wh1 = whf[:BACKBONE_FEAT]                            # backbone part
    wh2 = whf[BACKBONE_FEAT:]                            # feature-branch part

    # Precomputed aux-ReLU column mask (replaces per-tile iota + compares).
    aux_mask = jnp.zeros((1, NOUT_pad), jnp.float32).at[
        0, num_classes:num_classes + aux_num_classes].set(1.0)

    bf16 = jnp.bfloat16
    return dict(
        pool=pool.astype(bf16),
        wb=pad2(wb, C_pad, F1_pad).astype(bf16),
        bb=pad_row(bb, F1_pad),
        w1=pad2(w1, F_pad, D1_pad).astype(bf16),
        b1=pad_row(b1, D1_pad),
        w2=pad2(w2, D1_pad, D2_pad).astype(bf16),
        b2=pad_row(b2, D2_pad),
        wh1=pad2(wh1, F1_pad, NOUT_pad).astype(bf16),
        wh2=pad2(wh2, D2_pad, NOUT_pad).astype(bf16),
        bh=pad_row(bhf, NOUT_pad),
        aux_mask=aux_mask,
        dims=dict(num_classes=num_classes, aux_num_classes=aux_num_classes,
                  C_pad=C_pad, F_pad=F_pad, CHW_pad=CHW_pad, K_TILE=K_TILE,
                  NOUT_pad=NOUT_pad),
    )


def custom_model_forward(img, feat, params, *, batch_tile=128,
                         vmem_limit_bytes=64 * 1024 * 1024):
    # batch_tile: 128 for v5e; 256 recommended on v6e/v7x when B and VMEM allow
    # (pick so B_pad/batch_tile >= 2 on v7x to use both TensorCores).
    B, C, H, W = img.shape
    dims = params["dims"]
    NC, AUX = dims["num_classes"], dims["aux_num_classes"]
    C_pad, F_pad = dims["C_pad"], dims["F_pad"]
    CHW_pad, K_TILE, NOUT_pad = dims["CHW_pad"], dims["K_TILE"], dims["NOUT_pad"]
    CHW = C * H * W

    # Batch tiling: small batches go in ONE full-size block (no padding copy);
    # large batches are tiled at batch_tile (padding only for the remainder).
    if B <= batch_tile:
        TB, B_pad = B, B
    else:
        TB, B_pad = batch_tile, _round_up(B, batch_tile)

    # img: free reshape of contiguous NCHW, kept f32 in HBM (cast to bf16 inside
    # the kernel).  Materialize a padded copy only when strictly required.
    img2d = img.reshape(B, CHW)
    if (B_pad, CHW_pad) != (B, CHW):
        img2d = jnp.zeros((B_pad, CHW_pad), img2d.dtype).at[:B, :CHW].set(img2d)

    F = feat.shape[1]
    feat_p = feat
    if (B_pad, F_pad) != (B, F):
        feat_p = jnp.zeros((B_pad, F_pad), feat.dtype).at[:B, :F].set(feat)

    grid = (B_pad // TB, CHW_pad // K_TILE)      # (batch parallel, CHW reduction)

    img_spec = pl.BlockSpec((TB, K_TILE), lambda b, k: (b, k))
    feat_spec = pl.BlockSpec((TB, F_pad), lambda b, k: (b, 0))
    pool_spec = pl.BlockSpec((K_TILE, C_pad), lambda b, k: (k, 0))

    def const_spec(shape):
        # Constant block index -> DMA'd once, resident across all grid steps.
        return pl.BlockSpec(shape, lambda b, k: (0, 0))

    weights = (params["wb"], params["bb"],
               params["w1"], params["b1"], params["w2"], params["b2"],
               params["wh1"], params["wh2"], params["bh"], params["aux_mask"])

    kernel = functools.partial(custom_model_kernel, 1.0 / float(H * W))

    out = pl.pallas_call(
        kernel,
        grid=grid,
        out_shape=jax.ShapeDtypeStruct((B_pad, NOUT_pad), jnp.float32),
        in_specs=[img_spec, feat_spec, pool_spec]
                 + [const_spec(w.shape) for w in weights],
        out_specs=pl.BlockSpec((TB, NOUT_pad), lambda b, k: (b, 0)),
        scratch_shapes=[pltpu.VMEM((TB, C_pad), jnp.float32)],   # pooled accumulator
        compiler_params=pltpu.CompilerParams(
            dimension_semantics=("parallel", "arbitrary"),
            vmem_limit_bytes=vmem_limit_bytes),
    )(img2d, feat_p, params["pool"], *weights)

    return {"head": out[:B, :NC], "aux_head": out[:B, NC:NC + AUX]}


if __name__ == "__main__":
    B, C, H, W = 2, 4, 16, 16
    NUM_FEATURE_COLS = 8
    NUM_CLASSES = 5
    AUX_NUM_CLASSES = 3

    key = jax.random.PRNGKey(0)
    k_img, k_feat, k_params = jax.random.split(key, 3)

    img = jax.random.normal(k_img, (B, C, H, W), jnp.float32)
    feat = jax.random.normal(k_feat, (B, NUM_FEATURE_COLS), jnp.float32)
    params = init_params(k_params, C, NUM_FEATURE_COLS, NUM_CLASSES,
                         AUX_NUM_CLASSES, hw=H * W)

    out = custom_model_forward(img, feat, params)
    jax.block_until_ready(out)

    assert out["head"].shape == (B, NUM_CLASSES)
    assert out["aux_head"].shape == (B, AUX_NUM_CLASSES)
    assert bool(jnp.all(out["aux_head"] >= 0.0))
    print("KERNEL_OK")
</pallas_src>

<mosaic_0001>
module attributes {stable_mosaic.version = 11 : i64} {
  func.func @custom_model_kernel(%arg0: i32, %arg1: i32, %arg2: memref<2x1024xf32, #tpu.memory_space<vmem>>, %arg3: memref<2x128xf32, #tpu.memory_space<vmem>>, %arg4: memref<1024x128xbf16, #tpu.memory_space<vmem>>, %arg5: memref<128x1024xbf16, #tpu.memory_space<vmem>>, %arg6: memref<1x1024xf32, #tpu.memory_space<vmem>>, %arg7: memref<128x384xbf16, #tpu.memory_space<vmem>>, %arg8: memref<1x384xf32, #tpu.memory_space<vmem>>, %arg9: memref<384x128xbf16, #tpu.memory_space<vmem>>, %arg10: memref<1x128xf32, #tpu.memory_space<vmem>>, %arg11: memref<1024x128xbf16, #tpu.memory_space<vmem>>, %arg12: memref<128x128xbf16, #tpu.memory_space<vmem>>, %arg13: memref<1x128xf32, #tpu.memory_space<vmem>>, %arg14: memref<1x128xf32, #tpu.memory_space<vmem>>, %arg15: memref<2x128xf32, #tpu.memory_space<vmem>>, %arg16: memref<2x128xf32, #tpu.memory_space<vmem>>) attributes {dimension_semantics = [#tpu.dimension_semantics<parallel>, #tpu.dimension_semantics<arbitrary>], iteration_bounds = array<i64: 1, 1>, scalar_prefetch = 0 : i64, scratch_operands = 1 : i64, tpu.core_type = #tpu.core_type<tc>, window_params = [{transform_indices = @transform_0, window_bounds = array<i64: 2, 1024>}, {transform_indices = @transform_1, window_bounds = array<i64: 2, 128>}, {transform_indices = @transform_2, window_bounds = array<i64: 1024, 128>}, {pipeline_mode = #tpu.pipeline_mode<synchronous>, transform_indices = @transform_3, window_bounds = array<i64: 128, 1024>}, {pipeline_mode = #tpu.pipeline_mode<synchronous>, transform_indices = @transform_4, window_bounds = array<i64: 1, 1024>}, {pipeline_mode = #tpu.pipeline_mode<synchronous>, transform_indices = @transform_5, window_bounds = array<i64: 128, 384>}, {pipeline_mode = #tpu.pipeline_mode<synchronous>, transform_indices = @transform_6, window_bounds = array<i64: 1, 384>}, {pipeline_mode = #tpu.pipeline_mode<synchronous>, transform_indices = @transform_7, window_bounds = array<i64: 384, 128>}, {pipeline_mode = #tpu.pipeline_mode<synchronous>, transform_indices = @transform_8, window_bounds = array<i64: 1, 128>}, {pipeline_mode = #tpu.pipeline_mode<synchronous>, transform_indices = @transform_9, window_bounds = array<i64: 1024, 128>}, {pipeline_mode = #tpu.pipeline_mode<synchronous>, transform_indices = @transform_10, window_bounds = array<i64: 128, 128>}, {pipeline_mode = #tpu.pipeline_mode<synchronous>, transform_indices = @transform_11, window_bounds = array<i64: 1, 128>}, {pipeline_mode = #tpu.pipeline_mode<synchronous>, transform_indices = @transform_12, window_bounds = array<i64: 1, 128>}, {transform_indices = @transform_13, window_bounds = array<i64: 2, 128>}]} {
    %c0_i32 = arith.constant 0 : i32
    %0 = arith.cmpi eq, %arg1, %c0_i32 : i32
    %1 = arith.extui %0 : i1 to i32
    %c0_i32_0 = arith.constant 0 : i32
    %2 = arith.cmpi ne, %1, %c0_i32_0 : i32
    scf.if %2 {
      %cst_10 = arith.constant 0.000000e+00 : f32
      %13 = vector.broadcast %cst_10 : f32 to vector<2x128xf32>
      %c0_11 = arith.constant 0 : index
      %c0_12 = arith.constant 0 : index
      %14 = vector.load %arg16[%c0_11, %c0_12] : memref<2x128xf32, #tpu.memory_space<vmem>>, vector<2x128xf32>
      tpu.vector_store %arg16[%c0_11, %c0_12], %13 {strides = array<i32>} : memref<2x128xf32, #tpu.memory_space<vmem>>, vector<2x128xf32>,
    } else {
    }
    %c0 = arith.constant 0 : index
    %c0_1 = arith.constant 0 : index
    %3 = vector.load %arg16[%c0, %c0_1] : memref<2x128xf32, #tpu.memory_space<vmem>>, vector<2x128xf32>
    %c0_2 = arith.constant 0 : index
    %c0_3 = arith.constant 0 : index
    %4 = vector.load %arg2[%c0_2, %c0_3] : memref<2x1024xf32, #tpu.memory_space<vmem>>, vector<2x1024xf32>
    %5 = arith.truncf %4 : vector<2x1024xf32> to vector<2x1024xbf16>
    %c0_4 = arith.constant 0 : index
    %c0_5 = arith.constant 0 : index
    %6 = vector.load %arg4[%c0_4, %c0_5] : memref<1024x128xbf16, #tpu.memory_space<vmem>>, vector<1024x128xbf16>
    %cst = arith.constant dense<0.000000e+00> : vector<2x128xf32>
    %7 = tpu.matmul %5, %6, %cst {dimension_numbers = #tpu.dot_dimension_numbers<[1], [0], [0], [1], [0, 0, 1, 1], [], []>} : vector<2x1024xbf16>, vector<1024x128xbf16>, vector<2x128xf32> -> vector<2x128xf32>
    %8 = arith.addf %3, %7 : vector<2x128xf32>
    %c0_6 = arith.constant 0 : index
    %c0_7 = arith.constant 0 : index
    %9 = vector.load %arg16[%c0_6, %c0_7] : memref<2x128xf32, #tpu.memory_space<vmem>>, vector<2x128xf32>
    tpu.vector_store %arg16[%c0_6, %c0_7], %8 {strides = array<i32>} : memref<2x128xf32, #tpu.memory_space<vmem>>, vector<2x128xf32>,
    %c0_i32_8 = arith.constant 0 : i32
    %10 = arith.cmpi eq, %arg1, %c0_i32_8 : i32
    %11 = arith.extui %10 : i1 to i32
    %c0_i32_9 = arith.constant 0 : i32
    %12 = arith.cmpi ne, %11, %c0_i32_9 : i32
    scf.if %12 {
      %c0_10 = arith.constant 0 : index
      %c0_11 = arith.constant 0 : index
      %13 = vector.load %arg16[%c0_10, %c0_11] : memref<2x128xf32, #tpu.memory_space<vmem>>, vector<2x128xf32>
      %cst_12 = arith.constant 3.906250e-03 : f32
      %14 = vector.broadcast %cst_12 : f32 to vector<2x128xf32>
      %15 = arith.mulf %13, %14 : vector<2x128xf32>
      %16 = arith.truncf %15 : vector<2x128xf32> to vector<2x128xbf16>
      %c0_13 = arith.constant 0 : index
      %c0_14 = arith.constant 0 : index
      %17 = vector.load %arg5[%c0_13, %c0_14] : memref<128x1024xbf16, #tpu.memory_space<vmem>>, vector<128x1024xbf16>
      %cst_15 = arith.constant dense<0.000000e+00> : vector<2x1024xf32>
      %18 = tpu.matmul %16, %17, %cst_15 {dimension_numbers = #tpu.dot_dimension_numbers<[1], [0], [0], [1], [0, 0, 1, 1], [], []>} : vector<2x128xbf16>, vector<128x1024xbf16>, vector<2x1024xf32> -> vector<2x1024xf32>
      %c0_16 = arith.constant 0 : index
      %c0_17 = arith.constant 0 : index
      %19 = vector.load %arg6[%c0_16, %c0_17] : memref<1x1024xf32, #tpu.memory_space<vmem>>, vector<1x1024xf32>
      %20 = vector.broadcast %19 : vector<1x1024xf32> to vector<2x1024xf32>
      %21 = arith.addf %18, %20 : vector<2x1024xf32>
      %c0_18 = arith.constant 0 : index
      %c0_19 = arith.constant 0 : index
      %22 = vector.load %arg3[%c0_18, %c0_19] : memref<2x128xf32, #tpu.memory_space<vmem>>, vector<2x128xf32>
      %23 = arith.truncf %22 : vector<2x128xf32> to vector<2x128xbf16>
      %c0_20 = arith.constant 0 : index
      %c0_21 = arith.constant 0 : index
      %24 = vector.load %arg7[%c0_20, %c0_21] : memref<128x384xbf16, #tpu.memory_space<vmem>>, vector<128x384xbf16>
      %cst_22 = arith.constant dense<0.000000e+00> : vector<2x384xf32>
      %25 = tpu.matmul %23, %24, %cst_22 {dimension_numbers = #tpu.dot_dimension_numbers<[1], [0], [0], [1], [0, 0, 1, 1], [], []>} : vector<2x128xbf16>, vector<128x384xbf16>, vector<2x384xf32> -> vector<2x384xf32>
      %c0_23 = arith.constant 0 : index
      %c0_24 = arith.constant 0 : index
      %26 = vector.load %arg8[%c0_23, %c0_24] : memref<1x384xf32, #tpu.memory_space<vmem>>, vector<1x384xf32>
      %27 = vector.broadcast %26 : vector<1x384xf32> to vector<2x384xf32>
      %28 = arith.addf %25, %27 : vector<2x384xf32>
      %cst_25 = arith.constant 0.000000e+00 : f32
      %29 = vector.broadcast %cst_25 : f32 to vector<2x384xf32>
      %30 = arith.cmpf ogt, %28, %29 : vector<2x384xf32>
      %cst_26 = arith.constant 0.000000e+00 : f32
      %31 = vector.broadcast %cst_26 : f32 to vector<2x384xf32>
      %32 = arith.minimumf %28, %31 : vector<2x384xf32>
      %33 = math.exp %32 : vector<2x384xf32>
      %cst_27 = arith.constant 1.000000e+00 : f32
      %34 = vector.broadcast %cst_27 : f32 to vector<2x384xf32>
      %35 = arith.subf %33, %34 : vector<2x384xf32>
      %cst_28 = arith.constant 1.67326319 : f32
      %36 = vector.broadcast %cst_28 : f32 to vector<2x384xf32>
      %37 = arith.mulf %36, %35 : vector<2x384xf32>
      %38 = arith.select %30, %28, %37 : vector<2x384xi1>, vector<2x384xf32>
      %cst_29 = arith.constant 1.05070102 : f32
      %39 = vector.broadcast %cst_29 : f32 to vector<2x384xf32>
      %40 = arith.mulf %39, %38 : vector<2x384xf32>
      %41 = arith.truncf %40 : vector<2x384xf32> to vector<2x384xbf16>
      %c0_30 = arith.constant 0 : index
      %c0_31 = arith.constant 0 : index
      %42 = vector.load %arg9[%c0_30, %c0_31] : memref<384x128xbf16, #tpu.memory_space<vmem>>, vector<384x128xbf16>
      %cst_32 = arith.constant dense<0.000000e+00> : vector<2x128xf32>
      %43 = tpu.matmul %41, %42, %cst_32 {dimension_numbers = #tpu.dot_dimension_numbers<[1], [0], [0], [1], [0, 0, 1, 1], [], []>} : vector<2x384xbf16>, vector<384x128xbf16>, vector<2x128xf32> -> vector<2x128xf32>
      %c0_33 = arith.constant 0 : index
      %c0_34 = arith.constant 0 : index
      %44 = vector.load %arg10[%c0_33, %c0_34] : memref<1x128xf32, #tpu.memory_space<vmem>>, vector<1x128xf32>
      %45 = vector.broadcast %44 : vector<1x128xf32> to vector<2x128xf32>
      %46 = arith.addf %43, %45 : vector<2x128xf32>
      %cst_35 = arith.constant 0.000000e+00 : f32
      %47 = vector.broadcast %cst_35 : f32 to vector<2x128xf32>
      %48 = arith.cmpf ogt, %46, %47 : vector<2x128xf32>
      %cst_36 = arith.constant 0.000000e+00 : f32
      %49 = vector.broadcast %cst_36 : f32 to vector<2x128xf32>
      %50 = arith.minimumf %46, %49 : vector<2x128xf32>
      %51 = math.exp %50 : vector<2x128xf32>
      %cst_37 = arith.constant 1.000000e+00 : f32
      %52 = vector.broadcast %cst_37 : f32 to vector<2x128xf32>
      %53 = arith.subf %51, %52 : vector<2x128xf32>
      %cst_38 = arith.constant 1.67326319 : f32
      %54 = vector.broadcast %cst_38 : f32 to vector<2x128xf32>
      %55 = arith.mulf %54, %53 : vector<2x128xf32>
      %56 = arith.select %48, %46, %55 : vector<2x128xi1>, vector<2x128xf32>
      %cst_39 = arith.constant 1.05070102 : f32
      %57 = vector.broadcast %cst_39 : f32 to vector<2x128xf32>
      %58 = arith.mulf %57, %56 : vector<2x128xf32>
      %59 = arith.truncf %21 : vector<2x1024xf32> to vector<2x1024xbf16>
      %c0_40 = arith.constant 0 : index
      %c0_41 = arith.constant 0 : index
      %60 = vector.load %arg11[%c0_40, %c0_41] : memref<1024x128xbf16, #tpu.memory_space<vmem>>, vector<1024x128xbf16>
      %cst_42 = arith.constant dense<0.000000e+00> : vector<2x128xf32>
      %61 = tpu.matmul %59, %60, %cst_42 {dimension_numbers = #tpu.dot_dimension_numbers<[1], [0], [0], [1], [0, 0, 1, 1], [], []>} : vector<2x1024xbf16>, vector<1024x128xbf16>, vector<2x128xf32> -> vector<2x128xf32>
      %62 = arith.truncf %58 : vector<2x128xf32> to vector<2x128xbf16>
      %c0_43 = arith.constant 0 : index
      %c0_44 = arith.constant 0 : index
      %63 = vector.load %arg12[%c0_43, %c0_44] : memref<128x128xbf16, #tpu.memory_space<vmem>>, vector<128x128xbf16>
      %cst_45 = arith.constant dense<0.000000e+00> : vector<2x128xf32>
      %64 = tpu.matmul %62, %63, %cst_45 {dimension_numbers = #tpu.dot_dimension_numbers<[1], [0], [0], [1], [0, 0, 1, 1], [], []>} : vector<2x128xbf16>, vector<128x128xbf16>, vector<2x128xf32> -> vector<2x128xf32>
      %65 = arith.addf %61, %64 : vector<2x128xf32>
      %c0_46 = arith.constant 0 : index
      %c0_47 = arith.constant 0 : index
      %66 = vector.load %arg13[%c0_46, %c0_47] : memref<1x128xf32, #tpu.memory_space<vmem>>, vector<1x128xf32>
      %67 = vector.broadcast %66 : vector<1x128xf32> to vector<2x128xf32>
      %68 = arith.addf %65, %67 : vector<2x128xf32>
      %c0_48 = arith.constant 0 : index
      %c0_49 = arith.constant 0 : index
      %69 = vector.load %arg14[%c0_48, %c0_49] : memref<1x128xf32, #tpu.memory_space<vmem>>, vector<1x128xf32>
      %cst_50 = arith.constant 0.000000e+00 : f32
      %70 = vector.broadcast %cst_50 : f32 to vector<2x128xf32>
      %71 = arith.minimumf %68, %70 : vector<2x128xf32>
      %72 = vector.broadcast %69 : vector<1x128xf32> to vector<2x128xf32>
      %73 = arith.mulf %72, %71 : vector<2x128xf32>
      %74 = arith.subf %68, %73 : vector<2x128xf32>
      %c0_51 = arith.constant 0 : index
      %c0_52 = arith.constant 0 : index
      %75 = vector.load %arg15[%c0_51, %c0_52] : memref<2x128xf32, #tpu.memory_space<vmem>>, vector<2x128xf32>
      tpu.vector_store %arg15[%c0_51, %c0_52], %74 {strides = array<i32>} : memref<2x128xf32, #tpu.memory_space<vmem>>, vector<2x128xf32>,
    } else {
    }
    return
  }
  func.func @transform_0(%arg0: i32, %arg1: i32) -> (i32, i32) {
    %c0_i32 = arith.constant 0 : i32
    return %arg0, %arg1 : i32, i32
  }
  func.func @transform_1(%arg0: i32, %arg1: i32) -> (i32, i32) {
    %c0_i32 = arith.constant 0 : i32
    %c0_i32_0 = arith.constant 0 : i32
    return %arg0, %c0_i32 : i32, i32
  }
  func.func @transform_2(%arg0: i32, %arg1: i32) -> (i32, i32) {
    %c0_i32 = arith.constant 0 : i32
    %c0_i32_0 = arith.constant 0 : i32
    return %arg1, %c0_i32 : i32, i32
  }
  func.func @transform_3(%arg0: i32, %arg1: i32) -> (i32, i32) {
    %c0_i32 = arith.constant 0 : i32
    %c0_i32_0 = arith.constant 0 : i32
    %c0_i32_1 = arith.constant 0 : i32
    return %c0_i32, %c0_i32_0 : i32, i32
  }
  func.func @transform_4(%arg0: i32, %arg1: i32) -> (i32, i32) {
    %c0_i32 = arith.constant 0 : i32
    %c0_i32_0 = arith.constant 0 : i32
    %c0_i32_1 = arith.constant 0 : i32
    return %c0_i32, %c0_i32_0 : i32, i32
  }
  func.func @transform_5(%arg0: i32, %arg1: i32) -> (i32, i32) {
    %c0_i32 = arith.constant 0 : i32
    %c0_i32_0 = arith.constant 0 : i32
    %c0_i32_1 = arith.constant 0 : i32
    return %c0_i32, %c0_i32_0 : i32, i32
  }
  func.func @transform_6(%arg0: i32, %arg1: i32) -> (i32, i32) {
    %c0_i32 = arith.constant 0 : i32
    %c0_i32_0 = arith.constant 0 : i32
    %c0_i32_1 = arith.constant 0 : i32
    return %c0_i32, %c0_i32_0 : i32, i32
  }
  func.func @transform_7(%arg0: i32, %arg1: i32) -> (i32, i32) {
    %c0_i32 = arith.constant 0 : i32
    %c0_i32_0 = arith.constant 0 : i32
    %c0_i32_1 = arith.constant 0 : i32
    return %c0_i32, %c0_i32_0 : i32, i32
  }
  func.func @transform_8(%arg0: i32, %arg1: i32) -> (i32, i32) {
    %c0_i32 = arith.constant 0 : i32
    %c0_i32_0 = arith.constant 0 : i32
    %c0_i32_1 = arith.constant 0 : i32
    return %c0_i32, %c0_i32_0 : i32, i32
  }
  func.func @transform_9(%arg0: i32, %arg1: i32) -> (i32, i32) {
    %c0_i32 = arith.constant 0 : i32
    %c0_i32_0 = arith.constant 0 : i32
    %c0_i32_1 = arith.constant 0 : i32
    return %c0_i32, %c0_i32_0 : i32, i32
  }
  func.func @transform_10(%arg0: i32, %arg1: i32) -> (i32, i32) {
    %c0_i32 = arith.constant 0 : i32
    %c0_i32_0 = arith.constant 0 : i32
    %c0_i32_1 = arith.constant 0 : i32
    return %c0_i32, %c0_i32_0 : i32, i32
  }
  func.func @transform_11(%arg0: i32, %arg1: i32) -> (i32, i32) {
    %c0_i32 = arith.constant 0 : i32
    %c0_i32_0 = arith.constant 0 : i32
    %c0_i32_1 = arith.constant 0 : i32
    return %c0_i32, %c0_i32_0 : i32, i32
  }
  func.func @transform_12(%arg0: i32, %arg1: i32) -> (i32, i32) {
    %c0_i32 = arith.constant 0 : i32
    %c0_i32_0 = arith.constant 0 : i32
    %c0_i32_1 = arith.constant 0 : i32
    return %c0_i32, %c0_i32_0 : i32, i32
  }
  func.func @transform_13(%arg0: i32, %arg1: i32) -> (i32, i32) {
    %c0_i32 = arith.constant 0 : i32
    %c0_i32_0 = arith.constant 0 : i32
    return %arg0, %c0_i32 : i32, i32
  }
}

</mosaic_0001>

<bundles_post_ra>
// kernel: tpu_custom_call.1
= control target key start
LH: loop header
LB: loop body
LE: loop exit
PB: predicated region body
PF: predicated region fallthrough
CT: control target
= control target key end

     0   :  { %18 = vsyncpa [#allocation4], 0  ;;  %s4410_s0 = inlined_call_operand.hbm [shape: f32[2,1024], index: 0, kind: input, shape index: {}]   ;;  %s4411_s1 = inlined_call_operand.hbm [shape: f32[2,128], index: 1, kind: input, shape index: {}]   ;;  %s4412_s2 = inlined_call_operand.hbm [shape: bf16[1024,128], index: 2, kind: input, shape index: {}]   ;;  %s4413_s3 = inlined_call_operand.hbm [shape: bf16[128,1024], index: 3, kind: input, shape index: {}]   ;;  %s4414_s4 = inlined_call_operand.hbm [shape: f32[1,1024], index: 4, kind: input, shape index: {}]   ;;  %s4415_s5 = inlined_call_operand.hbm [shape: bf16[128,384], index: 5, kind: input, shape index: {}]   ;;  %s4416_s6 = inlined_call_operand.hbm [shape: f32[1,384], index: 6, kind: input, shape index: {}]   ;;  %s4417_s7 = inlined_call_operand.hbm [shape: bf16[384,128], index: 7, kind: input, shape index: {}]   ;;  %s4418_s8 = inlined_call_operand.hbm [shape: f32[1,128], index: 8, kind: input, shape index: {}]   ;;  %s4419_s9 = inlined_call_operand.hbm [shape: bf16[1024,128], index: 9, kind: input, shape index: {}]   ;;  %s4420_s10 = inlined_call_operand.hbm [shape: bf16[128,128], index: 10, kind: input, shape index: {}]   ;;  %s4421_s11 = inlined_call_operand.hbm [shape: f32[1,128], index: 11, kind: input, shape index: {}]   ;;  %s4422_s12 = inlined_call_operand.hbm [shape: f32[1,128], index: 12, kind: input, shape index: {}]   ;;  %s4423_s13 = inlined_call_operand.hbm [shape: f32[2,128], index: 13, kind: output, shape index: {}]  }
   0x1   :  { %19 = vsyncpa [#allocation7], 0 }
   0x2   :  { %20 = vsyncpa [#allocation10], 0 }
   0x3   :  { %21 = vsyncpa [#allocation13], 0 }
   0x4   :  { %22 = vsyncpa [#allocation16], 0 }
   0x5   :  { %23 = vsyncpa [#allocation19], 0 }
   0x6   :  { %24 = vsyncpa [#allocation22], 0 }
   0x7   :  { %25 = vsyncpa [#allocation5], 0  ;;  %s4027_s25 = smov [#allocation6]   ;;  %s4028_s27 = smov [#allocation9]  }
   0x8   :  { %s42_s26 = sshll.u32 %s4027_s25, 4  ;;  %s63_s28 = sshll.u32 %s4028_s27, 4  ;;  %s43_s26 = int_to_ptr.vmem [resolvable:$true] %s42_s26  ;;  %s4121_s28 = int_to_ptr.vmem [resolvable:$true] %s63_s28 }
   0x9   :  { %s3703_s14 = scalar_lea.hbm %s4411_s1, 32 }
   0xa   :  { %p3704_p0 = scmp.ne.s32.totalorder %s4411_s1, %s3703_s14  ;;  %p3707_p1 = scmp.lt.u32.totalorder %s3703_s14, %s4411_s1 }
   0xc   :  { %p3709_p2 = pnand %p3707_p1, %p3704_p0 }
   0xe   :  { %3712 = shalt.err (!%p3709_p2)
}
   0xf   :  { %s3713_s19 = scalar_lea.vmem %s43_s26, 32  ;;  %p3718_p4 = scmp.lt.s32.totalorder %s43_s26, %s43_s26 }
  0x10   :  { %p3714_p3 = scmp.ne.s32.totalorder %s43_s26, %s3713_s19  ;;  %p3719_p5 = scmp.lt.s32.totalorder %s3713_s19, %s3713_s19 }
  0x12   :  { %p3720_p6 = por %p3719_p5, %p3718_p4 }
  0x14   :  { %p3721_p7 = pnand %p3720_p6, %p3714_p3 }
  0x16   :  { %3724 = shalt.err (!%p3721_p7)
}
  0x17   :  { %45 = dma.hbm_to_vmem [thread:$0]  %s4411_s1, 32, %s43_s26, [#allocation7]  }
  0x18   :  { %s3725_s24 = scalar_lea.hbm %s4413_s3, 8192 }
  0x19   :  { %p3726_p8 = scmp.ne.s32.totalorder %s4413_s3, %s3725_s24  ;;  %p3729_p9 = scmp.lt.u32.totalorder %s3725_s24, %s4413_s3 }
  0x1b   :  { %p3731_p10 = pnand %p3729_p9, %p3726_p8 }
  0x1d   :  { %3734 = shalt.err (!%p3731_p10)
}
  0x1e   :  { %s3735_s14 = scalar_lea.vmem %s4121_s28, 8192  ;;  %p3740_p12 = scmp.lt.s32.totalorder %s4121_s28, %s4121_s28 }
  0x1f   :  { %p3736_p11 = scmp.ne.s32.totalorder %s4121_s28, %s3735_s14  ;;  %p3741_p13 = scmp.lt.s32.totalorder %s3735_s14, %s3735_s14 }
  0x21   :  { %p3742_p0 = por %p3741_p13, %p3740_p12 }
  0x23   :  { %p3743_p1 = pnand %p3742_p0, %p3736_p11 }
  0x25   :  { %3746 = shalt.err (!%p3743_p1)
}
  0x26   :  { %s4029_s1 = smov 512   ;;  %s4030_s26 = smov 32  }
  0x27   :  { %69 = dma.hbm_to_vmem [thread:$0]  %s4413_s3, 8192, %s4121_s28, [#allocation10], %s4029_s1, %s4029_s1, %s4030_s26  }
  0x28   :  { %s4031_s17 = smov [#allocation12]   ;;  %s3747_s21 = scalar_lea.hbm %s4415_s5, 3072 }
  0x29   :  { %s85_s18 = sshll.u32 %s4031_s17, 4  ;;  %p3748_p2 = scmp.ne.s32.totalorder %s4415_s5, %s3747_s21  ;;  %s86_s18 = int_to_ptr.vmem [resolvable:$true] %s85_s18 }
  0x2a   :  { %p3751_p3 = scmp.lt.u32.totalorder %s3747_s21, %s4415_s5 }
  0x2c   :  { %p3753_p4 = pnand %p3751_p3, %p3748_p2 }
  0x2e   :  { %3756 = shalt.err (!%p3753_p4)
}
  0x2f   :  { %s3757_s27 = scalar_lea.vmem %s86_s18, 3072  ;;  %p3762_p6 = scmp.lt.s32.totalorder %s86_s18, %s86_s18 }
  0x30   :  { %p3758_p5 = scmp.ne.s32.totalorder %s86_s18, %s3757_s27  ;;  %p3763_p7 = scmp.lt.s32.totalorder %s3757_s27, %s3757_s27 }
  0x32   :  { %p3764_p8 = por %p3763_p7, %p3762_p6 }
  0x34   :  { %p3765_p9 = pnand %p3764_p8, %p3758_p5 }
  0x36   :  { %3768 = shalt.err (!%p3765_p9)
}
  0x37   :  { %s4032_s3 = smov 192   ;;  %s4033_s28 = smov 12  }
  0x38   :  { %91 = dma.hbm_to_vmem [thread:$0]  %s4415_s5, 3072, %s86_s18, [#allocation13], %s4032_s3, %s4032_s3, %s4033_s28  }
  0x39   :  { %s4034_s14 = smov [#allocation15]   ;;  %s4035_s26 = smov [#allocation18]  }
  0x3a   :  { %s107_s1 = sshll.u32 %s4034_s14, 4  ;;  %s129_s15 = sshll.u32 %s4035_s26, 4  ;;  %s108_s1 = int_to_ptr.vmem [resolvable:$true] %s107_s1  ;;  %s130_s15 = int_to_ptr.vmem [resolvable:$true] %s129_s15 }
  0x3b   :  { %s3769_s19 = scalar_lea.hbm %s4417_s7, 3072 }
  0x3c   :  { %p3770_p10 = scmp.ne.s32.totalorder %s4417_s7, %s3769_s19  ;;  %p3773_p11 = scmp.lt.u32.totalorder %s3769_s19, %s4417_s7 }
  0x3e   :  { %p3775_p12 = pnand %p3773_p11, %p3770_p10 }
  0x40   :  { %3778 = shalt.err (!%p3775_p12)
}
  0x41   :  { %s3779_s5 = scalar_lea.vmem %s108_s1, 3072  ;;  %p3784_p0 = scmp.lt.s32.totalorder %s108_s1, %s108_s1 }
  0x42   :  { %p3780_p13 = scmp.ne.s32.totalorder %s108_s1, %s3779_s5  ;;  %p3785_p1 = scmp.lt.s32.totalorder %s3779_s5, %s3779_s5 }
  0x44   :  { %p3786_p2 = por %p3785_p1, %p3784_p0 }
  0x46   :  { %p3787_p3 = pnand %p3786_p2, %p3780_p13 }
  0x48   :  { %3790 = shalt.err (!%p3787_p3)
}
  0x49   :  { %s4036_s18 = smov 64   ;;  %s4037_s24 = smov 4  }
  0x4a   :  { %113 = dma.hbm_to_vmem [thread:$0]  %s4417_s7, 3072, %s108_s1, [#allocation16], %s4036_s18, %s4036_s18, %s4037_s24  }
  0x4b   :  { %s3791_s29 = scalar_lea.hbm %s4419_s9, 8192 }
  0x4c   :  { %p3792_p4 = scmp.ne.s32.totalorder %s4419_s9, %s3791_s29  ;;  %p3795_p5 = scmp.lt.u32.totalorder %s3791_s29, %s4419_s9 }
  0x4e   :  { %p3797_p6 = pnand %p3795_p5, %p3792_p4 }
  0x50   :  { %3800 = shalt.err (!%p3797_p6)
}
  0x51   :  { %s3801_s17 = scalar_lea.vmem %s130_s15, 8192  ;;  %p3806_p8 = scmp.lt.s32.totalorder %s130_s15, %s130_s15 }
  0x52   :  { %p3802_p7 = scmp.ne.s32.totalorder %s130_s15, %s3801_s17  ;;  %p3807_p9 = scmp.lt.s32.totalorder %s3801_s17, %s3801_s17 }
  0x54   :  { %p3808_p10 = por %p3807_p9, %p3806_p8 }
  0x56   :  { %p3809_p11 = pnand %p3808_p10, %p3802_p7 }
  0x58   :  { %3812 = shalt.err (!%p3809_p11)
}
  0x59   :  { %135 = dma.hbm_to_vmem [thread:$0]  %s4419_s9, 8192, %s130_s15, [#allocation19], %s4036_s18, %s4036_s18, %s4037_s24  }
  0x5a   :  { %s4038_s19 = smov [#allocation21]   ;;  %s4039_s21 = smov [#allocation3]  }
  0x5b   :  { %s154_s20 = sshll.u32 %s4038_s19, 4  ;;  %s32_s22 = sshll.u32 %s4039_s21, 4  ;;  %s155_s20 = int_to_ptr.vmem [resolvable:$true] %s154_s20  ;;  %s33_s22 = int_to_ptr.vmem [resolvable:$true] %s32_s22 }
  0x5c   :  { %s3813_s25 = scalar_lea.hbm %s4421_s11, 16 }
  0x5d   :  { %p3814_p12 = scmp.ne.s32.totalorder %s4421_s11, %s3813_s25  ;;  %p3817_p13 = scmp.lt.u32.totalorder %s3813_s25, %s4421_s11 }
  0x5f   :  { %p3819_p0 = pnand %p3817_p13, %p3814_p12 }
  0x61   :  { %3822 = shalt.err (!%p3819_p0)
}
  0x62   :  { %s3823_s9 = scalar_lea.vmem %s155_s20, 16  ;;  %s3827_s15 = scalar_lea.vmem %s155_s20, 32 }
  0x63   :  { %p3824_p1 = scmp.ne.s32.totalorder %s155_s20, %s3823_s9  ;;  %p3828_p2 = scmp.lt.s32.totalorder %s155_s20, %s155_s20 }
  0x64   :  { %p3829_p3 = scmp.lt.s32.totalorder %s3827_s15, %s3823_s9 }
  0x66   :  { %p3830_p4 = por %p3829_p3, %p3828_p2 }
  0x68   :  { %p3831_p5 = pnand %p3830_p4, %p3824_p1 }
  0x6a   :  { %3834 = shalt.err (!%p3831_p5)
}
  0x6b   :  { %157 = dma.hbm_to_vmem [thread:$0]  %s4421_s11, 16, %s155_s20, [#allocation22]  }
  0x6c   :  { %s3835_s17 = scalar_lea.hbm %s4410_s0, 256 }
  0x6d   :  { %p3836_p6 = scmp.ne.s32.totalorder %s4410_s0, %s3835_s17  ;;  %p3839_p7 = scmp.lt.u32.totalorder %s3835_s17, %s4410_s0 }
  0x6f   :  { %p3841_p8 = pnand %p3839_p7, %p3836_p6 }
  0x71   :  { %3844 = shalt.err (!%p3841_p8)
}
  0x72   :  { %s3845_s23 = scalar_lea.vmem %s33_s22, 256  ;;  %p3850_p10 = scmp.lt.s32.totalorder %s33_s22, %s33_s22 }
  0x73   :  { %p3846_p9 = scmp.ne.s32.totalorder %s33_s22, %s3845_s23  ;;  %p3851_p11 = scmp.lt.s32.totalorder %s3845_s23, %s3845_s23 }
  0x75   :  { %p3852_p12 = por %p3851_p11, %p3850_p10 }
  0x77   :  { %p3853_p13 = pnand %p3852_p12, %p3846_p9 }
  0x79   :  { %3856 = shalt.err (!%p3853_p13)
}
  0x7a   :  { %35 = dma.hbm_to_vmem [thread:$0]  %s4410_s0, 256, %s33_s22, [#allocation4]  }
  0x7b   :  { %s4040_s5 = smov [#allocation8]   ;;  %s4041_s27 = smov [#allocation11]  }
  0x7c   :  { %s51_s25 = sshll.u32 %s4040_s5, 4  ;;  %s76_s3 = sshll.u32 %s4041_s27, 4  ;;  %s52_s25 = int_to_ptr.vmem [resolvable:$true] %s51_s25  ;;  %s77_s3 = int_to_ptr.vmem [resolvable:$true] %s76_s3 }
  0x7d   :  { %s3857_s9 = scalar_lea.hbm %s4412_s2, 8192 }
  0x7e   :  { %p3858_p0 = scmp.ne.s32.totalorder %s4412_s2, %s3857_s9  ;;  %p3861_p1 = scmp.lt.u32.totalorder %s3857_s9, %s4412_s2 }
  0x80   :  { %p3863_p2 = pnand %p3861_p1, %p3858_p0 }
  0x82   :  { %3866 = shalt.err (!%p3863_p2)
}
  0x83   :  { %s3867_s0 = scalar_lea.vmem %s52_s25, 8192  ;;  %p3872_p4 = scmp.lt.s32.totalorder %s52_s25, %s52_s25 }
  0x84   :  { %p3868_p3 = scmp.ne.s32.totalorder %s52_s25, %s3867_s0  ;;  %p3873_p5 = scmp.lt.s32.totalorder %s3867_s0, %s3867_s0 }
  0x86   :  { %p3874_p6 = por %p3873_p5, %p3872_p4 }
  0x88   :  { %p3875_p7 = pnand %p3874_p6, %p3868_p3 }
  0x8a   :  { %3878 = shalt.err (!%p3875_p7)
}
  0x8b   :  { %57 = dma.hbm_to_vmem [thread:$0]  %s4412_s2, 8192, %s52_s25, [#allocation7], %s4036_s18, %s4036_s18, %s4037_s24  }
  0x8c   :  { %s3879_s1 = scalar_lea.hbm %s4414_s4, 128 }
  0x8d   :  { %p3880_p8 = scmp.ne.s32.totalorder %s4414_s4, %s3879_s1  ;;  %p3883_p9 = scmp.lt.u32.totalorder %s3879_s1, %s4414_s4 }
  0x8f   :  { %p3885_p10 = pnand %p3883_p9, %p3880_p8 }
  0x91   :  { %3888 = shalt.err (!%p3885_p10)
}
  0x92   :  { %s3889_s20 = scalar_lea.vmem %s77_s3, 128  ;;  %p3894_p12 = scmp.lt.s32.totalorder %s77_s3, %s77_s3 }
  0x93   :  { %p3890_p11 = scmp.ne.s32.totalorder %s77_s3, %s3889_s20  ;;  %p3895_p13 = scmp.lt.s32.totalorder %s3889_s20, %s3889_s20 }
  0x95   :  { %p3896_p0 = por %p3895_p13, %p3894_p12 }
  0x97   :  { %p3897_p1 = pnand %p3896_p0, %p3890_p11 }
  0x99   :  { %3900 = shalt.err (!%p3897_p1)
}
  0x9a   :  { %79 = dma.hbm_to_vmem [thread:$0]  %s4414_s4, 128, %s77_s3, [#allocation10]  }
  0x9b   :  { %s4042_s25 = smov [#allocation14]   ;;  %s4043_s28 = smov [#allocation17]  }
  0x9c   :  { %s98_s27 = sshll.u32 %s4042_s25, 4  ;;  %s120_s29 = sshll.u32 %s4043_s28, 4  ;;  %s99_s27 = int_to_ptr.vmem [resolvable:$true] %s98_s27  ;;  %s121_s29 = int_to_ptr.vmem [resolvable:$true] %s120_s29 }
  0x9d   :  { %s3901_s30 = scalar_lea.hbm %s4416_s6, 48 }
  0x9e   :  { %p3902_p2 = scmp.ne.s32.totalorder %s4416_s6, %s3901_s30  ;;  %p3905_p3 = scmp.lt.u32.totalorder %s3901_s30, %s4416_s6 }
  0xa0   :  { %p3907_p4 = pnand %p3905_p3, %p3902_p2 }
  0xa2   :  { %3910 = shalt.err (!%p3907_p4)
}
  0xa3   :  { %s3911_s4 = scalar_lea.vmem %s99_s27, 48  ;;  %s3915_s3 = scalar_lea.vmem %s99_s27, 64 }
  0xa4   :  { %p3912_p5 = scmp.ne.s32.totalorder %s99_s27, %s3911_s4  ;;  %p3916_p6 = scmp.lt.s32.totalorder %s99_s27, %s99_s27 }
  0xa5   :  { %p3917_p7 = scmp.lt.s32.totalorder %s3915_s3, %s3911_s4 }
  0xa7   :  { %p3918_p8 = por %p3917_p7, %p3916_p6 }
  0xa9   :  { %p3919_p9 = pnand %p3918_p8, %p3912_p5 }
  0xab   :  { %3922 = shalt.err (!%p3919_p9)
}
  0xac   :  { %101 = dma.hbm_to_vmem [thread:$0]  %s4416_s6, 48, %s99_s27, [#allocation13]  }
  0xad   :  { %s3923_s19 = scalar_lea.hbm %s4418_s8, 16 }
  0xae   :  { %p3924_p10 = scmp.ne.s32.totalorder %s4418_s8, %s3923_s19  ;;  %p3927_p11 = scmp.lt.u32.totalorder %s3923_s19, %s4418_s8 }
  0xb0   :  { %p3929_p12 = pnand %p3927_p11, %p3924_p10 }
  0xb2   :  { %3932 = shalt.err (!%p3929_p12)
}
  0xb3   :  { %s3933_s2 = scalar_lea.vmem %s121_s29, 16  ;;  %s3937_s5 = scalar_lea.vmem %s121_s29, 32 }
  0xb4   :  { %p3934_p13 = scmp.ne.s32.totalorder %s121_s29, %s3933_s2  ;;  %p3938_p0 = scmp.lt.s32.totalorder %s121_s29, %s121_s29 }
  0xb5   :  { %p3939_p1 = scmp.lt.s32.totalorder %s3937_s5, %s3933_s2 }
  0xb7   :  { %p3940_p2 = por %p3939_p1, %p3938_p0 }
  0xb9   :  { %p3941_p3 = pnand %p3940_p2, %p3934_p13 }
  0xbb   :  { %3944 = shalt.err (!%p3941_p3)
}
  0xbc   :  { %123 = dma.hbm_to_vmem [thread:$0]  %s4418_s8, 16, %s121_s29, [#allocation16]  }
  0xbd   :  { %s4044_s27 = smov [#allocation20]   ;;  %s4045_s9 = smov [#allocation23]  }
  0xbe   :  { %s141_s28 = sshll.u32 %s4044_s27, 4  ;;  %s164_s15 = sshll.u32 %s4045_s9, 4  ;;  %s142_s28 = int_to_ptr.vmem [resolvable:$true] %s141_s28  ;;  %s165_s15 = int_to_ptr.vmem [resolvable:$true] %s164_s15 }
  0xbf   :  { %s3945_s26 = scalar_lea.hbm %s4420_s10, 1024 }
  0xc0   :  { %p3946_p4 = scmp.ne.s32.totalorder %s4420_s10, %s3945_s26  ;;  %p3949_p5 = scmp.lt.u32.totalorder %s3945_s26, %s4420_s10 }
  0xc2   :  { %p3951_p6 = pnand %p3949_p5, %p3946_p4 }
  0xc4   :  { %3954 = shalt.err (!%p3951_p6)
}
  0xc5   :  { %s3955_s8 = scalar_lea.vmem %s142_s28, 1024  ;;  %p3960_p8 = scmp.lt.s32.totalorder %s142_s28, %s142_s28 }
  0xc6   :  { %p3956_p7 = scmp.ne.s32.totalorder %s142_s28, %s3955_s8  ;;  %p3961_p9 = scmp.lt.s32.totalorder %s3955_s8, %s3955_s8 }
  0xc8   :  { %p3962_p10 = por %p3961_p9, %p3960_p8 }
  0xca   :  { %p3963_p11 = pnand %p3962_p10, %p3956_p7 }
  0xcc   :  { %3966 = shalt.err (!%p3963_p11)
}
  0xcd   :  { %147 = dma.hbm_to_vmem [thread:$0]  %s4420_s10, 1024, %s142_s28, [#allocation19], %s4036_s18, %s4036_s18, %s4037_s24  }
  0xce   :  { %s3967_s1 = scalar_lea.hbm %s4422_s12, 16 }
  0xcf   :  { %p3968_p12 = scmp.ne.s32.totalorder %s4422_s12, %s3967_s1  ;;  %p3971_p13 = scmp.lt.u32.totalorder %s3967_s1, %s4422_s12 }
  0xd1   :  { %p3973_p0 = pnand %p3971_p13, %p3968_p12 }
  0xd3   :  { %3976 = shalt.err (!%p3973_p0)
}
  0xd4   :  { %s3977_s20 = scalar_lea.vmem %s165_s15, 16  ;;  %s3981_s2 = scalar_lea.vmem %s165_s15, 32 }
  0xd5   :  { %p3978_p1 = scmp.ne.s32.totalorder %s165_s15, %s3977_s20  ;;  %p3982_p2 = scmp.lt.s32.totalorder %s165_s15, %s165_s15 }
  0xd6   :  { %p3983_p3 = scmp.lt.s32.totalorder %s3981_s2, %s3977_s20 }
  0xd8   :  { %p3984_p4 = por %p3983_p3, %p3982_p2 }
  0xda   :  { %p3985_p5 = pnand %p3984_p4, %p3978_p1 }
  0xdc   :  { %3988 = shalt.err (!%p3985_p5)
}
  0xdd   :  { %167 = dma.hbm_to_vmem [thread:$0]  %s4422_s12, 16, %s165_s15, [#allocation22]  }
  0xde   :  { %4011 = dma.done.wait [#allocation4], 256  }
  0xdf   :  { %4012 = vsyncadd [#allocation4], 4294967040 }
  0xe0   :  { %4013 = dma.done.wait [#allocation7], 8224  }
  0xe1   :  { %4014 = vsyncadd [#allocation7], 4294959072 }
  0xe2   :  { %4015 = dma.done.wait [#allocation10], 8320  }
  0xe3   :  { %4016 = vsyncadd [#allocation10], 4294958976 }
  0xe4   :  { %4017 = dma.done.wait [#allocation13], 3120  }
  0xe5   :  { %4018 = vsyncadd [#allocation13], 4294964176 }
  0xe6   :  { %4019 = dma.done.wait [#allocation16], 3088  }
  0xe7   :  { %4020 = vsyncadd [#allocation16], 4294964208 }
  0xe8   :  { %4021 = dma.done.wait [#allocation19], 9216  }
  0xe9   :  { %4022 = vsyncadd [#allocation19], 4294958080 }
  0xea   :  { %4023 = dma.done.wait [#allocation22], 32  }
  0xeb   :  { %4024 = vsyncadd [#allocation22], 4294967264  ;;  %v3501_v0 = vld [vmem:[#allocation8 + $0x40] sm:$0xff]   ;;  %v3505_v4 = vld [vmem:[#allocation8 + $0x48] sm:$0xff]   ;;  %v4046_v22 = vmov 1983009808   ;;  %v222_v24 = vlaneseq }
  0xec   :  { %v3502_v1 = vld [vmem:[#allocation8 + $0xc0] sm:$0xff]   ;;  %3192 = vmatprep.subr.bf16.mxu0 %v3501_v0  ;;  %v3506_v5 = vld [vmem:[#allocation8 + $0xc8] sm:$0xff]   ;;  %v3509_v8 = vld [vmem:[#allocation8 + $0x50] sm:$0xff]   ;;  %v220_v23 = vunpack.c.l.s4 %v4046_v22  ;;  %vm4049_vm0 = vmmov 0   ;;  %s4050_s12 = smov [#allocation24]  }
  0xed   :  { %v3503_v2 = vld [vmem:[#allocation8] sm:$0xff]   ;;  %3214 = vmatprep.subr.bf16.mxu1 %v3502_v1  ;;  %v3507_v6 = vld [vmem:[#allocation8 + $0x8] sm:$0xff]   ;;  %v3510_v9 = vld [vmem:[#allocation8 + $0xd0] sm:$0xff]   ;;  %v4296_v30 = vshrl.u32 %v222_v24, 7  ;;  %s2922_s24 = sshll.u32 %s4050_s12, 4  ;;  %s2923_s24 = int_to_ptr.vmem [resolvable:$true] %s2922_s24 }
  0xee   :  { %v3504_v3 = vld [vmem:[#allocation8 + $0x80] sm:$0xff]   ;;  %3193 = vmatpush3.bf16.msra.mxu0 %v3503_v2  ;;  %v3508_v7 = vld [vmem:[#allocation8 + $0x88] sm:$0xff]   ;;  %v3511_v10 = vld [vmem:[#allocation8 + $0x10] sm:$0xff]   ;;  %v221_v29 = vunpack.c.0.s8 %v220_v23  ;;  %s3989_s5 = scalar_lea.vmem %s2923_s24, 32  ;;  %p3994_p7 = scmp.lt.s32.totalorder %s2923_s24, %s2923_s24 }
  0xef   :  { %3215 = vmatpush3.bf16.msra.mxu1 %v3504_v3  ;;  %3194 = vmatprep.subr.bf16.mxu0 %v3505_v4  ;;  %v3512_v11 = vld [vmem:[#allocation8 + $0x90] sm:$0xff]   ;;  %v3513_v12 = vld [vmem:[#allocation8 + $0x58] sm:$0xff]   ;;  %v3517_v16 = vld [vmem:[#allocation8 + $0x60] sm:$0xff]   ;;  %p3990_p6 = scmp.ne.s32.totalorder %s2923_s24, %s3989_s5  ;;  %p3995_p8 = scmp.lt.s32.totalorder %s3989_s5, %s3989_s5 }
  0xf0   :  { %3216 = vmatprep.subr.bf16.mxu1 %v3506_v5  ;;  %v3514_v13 = vld [vmem:[#allocation8 + $0xd8] sm:$0xff]   ;;  %v3518_v17 = vld [vmem:[#allocation8 + $0xe0] sm:$0xff]   ;;  %v3521_v20 = vld [vmem:[#allocation8 + $0x68] sm:$0xff]   ;;  %v4299_v35 = vsub.s32 %v221_v29, %v4296_v30 }
  0xf1   :  { %v3515_v14 = vld [vmem:[#allocation8 + $0x18] sm:$0xff]   ;;  %v3519_v18 = vld [vmem:[#allocation8 + $0x20] sm:$0xff]   ;;  %v3522_v21 = vld [vmem:[#allocation8 + $0xe8] sm:$0xff]   ;;  %p3996_p9 = por %p3995_p8, %p3994_p7 }
  0xf2   :  { %3195 = vmatpush3.bf16.msra.mxu0 %v3507_v6  ;;  %v3516_v15 = vld [vmem:[#allocation8 + $0x98] sm:$0xff]   ;;  %v3520_v19 = vld [vmem:[#allocation8 + $0xa0] sm:$0xff]   ;;  %v3523_v25 = vld [vmem:[#allocation8 + $0x28] sm:$0xff]  }
  0xf3   :  { %3217 = vmatpush3.bf16.msra.mxu1 %v3508_v7  ;;  %3196 = vmatprep.subr.bf16.mxu0 %v3509_v8  ;;  %v3524_v26 = vld [vmem:[#allocation8 + $0xa8] sm:$0xff]   ;;  %v3525_v27 = vld [vmem:[#allocation8 + $0x70] sm:$0xff]   ;;  %v3529_v33 = vld [vmem:[#allocation8 + $0x78] sm:$0xff]   ;;  %p3997_p10 = pnand %p3996_p9, %p3990_p6 }
  0xf4   :  { %3218 = vmatprep.subr.bf16.mxu1 %v3510_v9  ;;  %v3526_v28 = vld [vmem:[#allocation8 + $0xf0] sm:$0xff]   ;;  %v3530_v34 = vld [vmem:[#allocation8 + $0xf8] sm:$0xff]   ;;  %v3534_v41 = vld [vmem:[#allocation8 + $0x140] sm:$0xff]  }
  0xf5   :  { %v3527_v31 = vld [vmem:[#allocation8 + $0x30] sm:$0xff]   ;;  %v3531_v36 = vld [vmem:[#allocation8 + $0x38] sm:$0xff]   ;;  %v3535_v42 = vld [vmem:[#allocation8 + $0x1c0] sm:$0xff]  }
  0xf6   :  { %3197 = vmatpush3.bf16.msra.mxu0 %v3511_v10  ;;  %v3528_v32 = vld [vmem:[#allocation8 + $0xb0] sm:$0xff]   ;;  %v3532_v37 = vld [vmem:[#allocation8 + $0xb8] sm:$0xff]   ;;  %v3536_v46 = vld [vmem:[#allocation8 + $0x100] sm:$0xff]  }
  0xf7   :  { %3219 = vmatpush3.bf16.msra.mxu1 %v3512_v11  ;;  %3198 = vmatprep.subr.bf16.mxu0 %v3513_v12  ;;  %v214_v38 = vld [vmem:[#allocation3] sm:$0xff]  ;;  %v3537_v49 = vld [vmem:[#allocation8 + $0x180] sm:$0xff]   ;;  %v3546_v60 = vld [vmem:[#allocation8 + $0x158] sm:$0xff]  }
  0xf8   :  { %3220 = vmatprep.subr.bf16.mxu1 %v3514_v13  ;;  %v225_v39 = vrot.slane %v214_v38, %v4299_v35  ;;  %v218_v40 = vcombine.high %v214_v38, %v214_v38  ;;  %v3538_v51 = vld [vmem:[#allocation8 + $0x148] sm:$0xff]   ;;  %v3542_v56 = vld [vmem:[#allocation8 + $0x150] sm:$0xff]   ;;  %v3547_v61 = vld [vmem:[#allocation8 + $0x1d8] sm:$0xff]  }
  0xf9   :  { %v3539_v53 = vld [vmem:[#allocation8 + $0x1c8] sm:$0xff]   ;;  %v3543_v57 = vld [vmem:[#allocation8 + $0x1d0] sm:$0xff]   ;;  %v3548_v62 = vld [vmem:[#allocation8 + $0x118] sm:$0xff]  }
  0xfa   :  { %3199 = vmatpush3.bf16.msra.mxu0 %v3515_v14  ;;  %v233_v43 = vcombine.high %v225_v39, %v225_v39  ;;  %v232_v44 = vrot.slane %v218_v40, %v4299_v35  ;;  %v260_v45 = vpack.c.bf16 %v225_v39, %v225_v39  ;;  %v3540_v54 = vld [vmem:[#allocation8 + $0x108] sm:$0xff]   ;;  %v3544_v58 = vld [vmem:[#allocation8 + $0x110] sm:$0xff]   ;;  %v3549_v63 = vld [vmem:[#allocation8 + $0x198] sm:$0xff]  }
  0xfb   :  { %3221 = vmatpush3.bf16.msra.mxu1 %v3516_v15  ;;  %3200 = vmatprep.subr.bf16.mxu0 %v3517_v16  ;;  %v3541_v55 = vld [vmem:[#allocation8 + $0x188] sm:$0xff]   ;;  %v3545_v59 = vld [vmem:[#allocation8 + $0x190] sm:$0xff]   ;;  %v3550_v0 = vld [vmem:[#allocation8 + $0x160] sm:$0xff]  }
  0xfc   :  { %3222 = vmatprep.subr.bf16.mxu1 %v3518_v17  ;;  %v261_v47 = vpack.c.bf16 %v233_v43, %v233_v43  ;;  %v234_v48 = vcombine.high %v232_v44, %v232_v44  ;;  %v262_v50 = vpack.c.bf16 %v232_v44, %v232_v44  ;;  %v3551_v1 = vld [vmem:[#allocation8 + $0x1e0] sm:$0xff]   ;;  %v3554_v4 = vld [vmem:[#allocation8 + $0x168] sm:$0xff]   ;;  %v3558_v8 = vld [vmem:[#allocation8 + $0x170] sm:$0xff]  }
  0xfd   :  { %v3552_v2 = vld [vmem:[#allocation8 + $0x120] sm:$0xff]   ;;  %v3555_v5 = vld [vmem:[#allocation8 + $0x1e8] sm:$0xff]   ;;  %v3559_v9 = vld [vmem:[#allocation8 + $0x1f0] sm:$0xff]  }
  0xfe   :  { %3201 = vmatpush3.bf16.msra.mxu0 %v3519_v18  ;;  %812 = vmatprep.mubr.bf16.mxu0 %v261_v47  ;;  %v263_v52 = vpack.c.bf16 %v234_v48, %v234_v48  ;;  %v3553_v3 = vld [vmem:[#allocation8 + $0x1a0] sm:$0xff]   ;;  %v3556_v6 = vld [vmem:[#allocation8 + $0x128] sm:$0xff]   ;;  %v3560_v10 = vld [vmem:[#allocation8 + $0x130] sm:$0xff]  }
  0xff   :  { %3223 = vmatpush3.bf16.msra.mxu1 %v3520_v19  ;;  %3202 = vmatprep.subr.bf16.mxu0 %v3521_v20  ;;  %v3557_v7 = vld [vmem:[#allocation8 + $0x1a8] sm:$0xff]   ;;  %v3561_v11 = vld [vmem:[#allocation8 + $0x1b0] sm:$0xff]   ;;  %v3562_v12 = vld [vmem:[#allocation8 + $0x178] sm:$0xff]  }
 0x100   :  { %3224 = vmatprep.subr.bf16.mxu1 %v3522_v21  ;;  %852 = vmatprep.mubr.bf16.mxu1 %v263_v52  ;;  %v3563_v13 = vld [vmem:[#allocation8 + $0x1f8] sm:$0xff]   ;;  %v957_v38 = vld [vmem:[#allocation9 + $0x48] sm:$0xff]  ;;  %v964_v40 = vld [vmem:[#allocation9 + $0x80] sm:$0xff] }
 0x101   :  { %v3564_v14 = vld [vmem:[#allocation8 + $0x138] sm:$0xff]   ;;  %v961_v39 = vld [vmem:[#allocation9 + $0x68] sm:$0xff]  ;;  %v976_v52 = vld [vmem:[#allocation9 + $0xe0] sm:$0xff] }
 0x102   :  { %3203 = vmatpush3.bf16.msra.mxu0 %v3523_v25  ;;  %v215_v15 = vld [vmem:[#allocation3 + $0x8] sm:$0xff]  ;;  %v965_v43 = vld [vmem:[#allocation9 + $0x88] sm:$0xff] }
 0x103   :  { %3225 = vmatpush3.bf16.msra.mxu1 %v3524_v26  ;;  %3204 = vmatprep.subr.bf16.mxu0 %v3525_v27  ;;  %v3565_v16 = vld [vmem:[#allocation8 + $0x1b8] sm:$0xff]   ;;  %v242_v17 = vrot.slane %v215_v15, %v4299_v35  ;;  %v235_v18 = vcombine.high %v215_v15, %v215_v15  ;;  %v948_v26 = vld [vmem:[#allocation9] sm:$0xff]  ;;  %v969_v44 = vld [vmem:[#allocation9 + $0xa8] sm:$0xff] }
 0x104   :  { %3226 = vmatprep.subr.bf16.mxu1 %v3526_v28  ;;  %v952_v27 = vld [vmem:[#allocation9 + $0x20] sm:$0xff]  ;;  %v949_v28 = vld [vmem:[#allocation9 + $0x8] sm:$0xff]  ;;  %v3020_v48 = vcombine.high %v965_v43, %v969_v44 }
 0x105   :  { %v250_v19 = vcombine.high %v242_v17, %v242_v17  ;;  %v249_v20 = vrot.slane %v235_v18, %v4299_v35  ;;  %v264_v21 = vpack.c.bf16 %v242_v17, %v242_v17  ;;  %v3001_v29 = vcombine.low %v948_v26, %v952_v27  ;;  %v1004_v17 = vld [vmem:[#allocation9 + $0x1c0] sm:$0xff] }
 0x106   :  { %3205 = vmatpush3.bf16.msra.mxu0 %v3527_v31  ;;  %v3002_v31 = vcombine.high %v948_v26, %v952_v27  ;;  %v1008_v18 = vld [vmem:[#allocation9 + $0x1e0] sm:$0xff]  ;;  %v954_v27 = vld [vmem:[#allocation9 + $0x30] sm:$0xff] }
 0x107   :  { %3227 = vmatpush3.bf16.msra.mxu1 %v3528_v32  ;;  %3206 = vmatprep.subr.bf16.mxu0 %v3529_v33  ;;  %v265_v22 = vpack.c.bf16 %v250_v19, %v250_v19  ;;  %v251_v23 = vcombine.high %v249_v20, %v249_v20  ;;  %v266_v24 = vpack.c.bf16 %v249_v20, %v249_v20  ;;  %v953_v32 = vld [vmem:[#allocation9 + $0x28] sm:$0xff]  ;;  %v956_v33 = vld [vmem:[#allocation9 + $0x40] sm:$0xff]  ;;  %v4048_v19 = vmov 0  }
 0x108   :  { %3228 = vmatprep.subr.bf16.mxu1 %v3530_v34  ;;  %v960_v34 = vld [vmem:[#allocation9 + $0x60] sm:$0xff]  ;;  %v3003_v35 = vcombine.low %v949_v28, %v953_v32  ;;  %v3058_v26 = vcombine.high %v1004_v17, %v1008_v18 }
 0x109   :  { %v267_v25 = vpack.c.bf16 %v251_v23, %v251_v23  ;;  %v1009_v23 = vld [vmem:[#allocation9 + $0x1e8] sm:$0xff] }
 0x10a   :  { %3207 = vmatpush3.bf16.msra.mxu0 %v3531_v36  ;;  %v3004_v36 = vcombine.high %v949_v28, %v953_v32  ;;  %v951_v28 = vld [vmem:[#allocation9 + $0x18] sm:$0xff] }
 0x10b   :  { %3229 = vmatpush3.bf16.msra.mxu1 %v3532_v37  ;;  %3236 = vmatprep.subr.bf16.mxu0 %v3534_v41  ;;  %v3010_v37 = vcombine.high %v956_v33, %v960_v34  ;;  %v3012_v41 = vcombine.high %v957_v38, %v961_v39 }
 0x10c   :  { %3258 = vmatprep.subr.bf16.mxu1 %v3535_v42  ;;  %v968_v42 = vld [vmem:[#allocation9 + $0xa0] sm:$0xff] }
 0x10d   :  { %813 = vmatmul.mubr.bf16.vlgmr.msra.gmra.mrb[0].mxu0 %v260_v45  ;;  %v3009_v45 = vcombine.low %v956_v33, %v960_v34  ;;  %v3018_v47 = vcombine.high %v964_v40, %v968_v42  ;;  %v3057_v34 = vcombine.low %v1004_v17, %v1008_v18  ;;  %v974_v17 = vld [vmem:[#allocation9 + $0xd0] sm:$0xff] }
 0x10e   :  { %3237 = vmatpush3.bf16.msra.mxu0 %v3536_v46  ;;  %853 = vmatmul.mubr.bf16.vlgmr.msra.gmra.mrb[0].mxu1 %v262_v50  ;;  %v3011_v46 = vcombine.low %v957_v38, %v961_v39  ;;  %v3019_v50 = vcombine.low %v965_v43, %v969_v44  ;;  %v978_v18 = vld [vmem:[#allocation9 + $0xf0] sm:$0xff] }
 0x10f   :  { %3238 = vmatprep.subr.bf16.mxu0 %v3538_v51  ;;  %3259 = vmatpush3.bf16.msra.mxu1 %v3537_v49  ;;  %v3017_v49 = vcombine.low %v964_v40, %v968_v42  ;;  %v972_v51 = vld [vmem:[#allocation9 + $0xc0] sm:$0xff] }
 0x110   :  { %3260 = vmatprep.subr.bf16.mxu1 %v3539_v53  ;;  %892 = vmatprep.mubr.bf16.mxu0 %v265_v22  ;;  %v973_v53 = vld [vmem:[#allocation9 + $0xc8] sm:$0xff] }
 0x111   :  { %932 = vmatprep.mubr.bf16.mxu1 %v267_v25  ;;  %v1005_v22 = vld [vmem:[#allocation9 + $0x1c8] sm:$0xff] }
 0x112   :  { %3239 = vmatpush3.bf16.msra.mxu0 %v3540_v54  ;;  %v3026_v54 = vcombine.high %v972_v51, %v976_v52 }
 0x113   :  { %3240 = vmatprep.subr.bf16.mxu0 %v3542_v56  ;;  %3261 = vmatpush3.bf16.msra.mxu1 %v3541_v55  ;;  %v977_v55 = vld [vmem:[#allocation9 + $0xe8] sm:$0xff]  ;;  %v4047_v56 = vmov 0.0  }
 0x114   :  { %3262 = vmatprep.subr.bf16.mxu1 %v3543_v57  ;;  %212 = vst [vmem:[#allocation2] sm:$0x3] %v4047_v56  ;;  %v3025_v57 = vcombine.low %v972_v51, %v976_v52 }
 0x116   :  { %3241 = vmatpush3.bf16.msra.mxu0 %v3544_v58  ;;  %v3027_v58 = vcombine.low %v973_v53, %v977_v55 }
 0x117   :  { %3242 = vmatprep.subr.bf16.mxu0 %v3546_v60  ;;  %3263 = vmatpush3.bf16.msra.mxu1 %v3545_v59  ;;  %v3028_v59 = vcombine.high %v973_v53, %v977_v55  ;;  %v980_v60 = vld [vmem:[#allocation9 + $0x100] sm:$0xff] }
 0x118   :  { %3264 = vmatprep.subr.bf16.mxu1 %v3547_v61  ;;  %v984_v61 = vld [vmem:[#allocation9 + $0x120] sm:$0xff] }
 0x11a   :  { %3243 = vmatpush3.bf16.msra.mxu0 %v3548_v62  ;;  %v981_v62 = vld [vmem:[#allocation9 + $0x108] sm:$0xff] }
 0x11b   :  { %3244 = vmatprep.subr.bf16.mxu0 %v3550_v0  ;;  %3265 = vmatpush3.bf16.msra.mxu1 %v3549_v63  ;;  %v3034_v63 = vcombine.high %v980_v60, %v984_v61  ;;  %v985_v0 = vld [vmem:[#allocation9 + $0x128] sm:$0xff] }
 0x11c   :  { %3266 = vmatprep.subr.bf16.mxu1 %v3551_v1  ;;  %v3033_v1 = vcombine.low %v980_v60, %v984_v61  ;;  %v213_v60 = vld [vmem:[#allocation2] sm:$0x3] }
 0x11e   :  { %3245 = vmatpush3.bf16.msra.mxu0 %v3552_v2  ;;  %v3035_v2 = vcombine.low %v981_v62, %v985_v0 }
 0x11f   :  { %3246 = vmatprep.subr.bf16.mxu0 %v3554_v4  ;;  %3267 = vmatpush3.bf16.msra.mxu1 %v3553_v3  ;;  %v3036_v3 = vcombine.high %v981_v62, %v985_v0  ;;  %v988_v4 = vld [vmem:[#allocation9 + $0x140] sm:$0xff]  ;;  %v958_v0 = vld [vmem:[#allocation9 + $0x50] sm:$0xff] }
 0x120   :  { %3268 = vmatprep.subr.bf16.mxu1 %v3555_v5  ;;  %v992_v5 = vld [vmem:[#allocation9 + $0x160] sm:$0xff] }
 0x122   :  { %3247 = vmatpush3.bf16.msra.mxu0 %v3556_v6  ;;  %v989_v6 = vld [vmem:[#allocation9 + $0x148] sm:$0xff] }
 0x123   :  { %3248 = vmatprep.subr.bf16.mxu0 %v3558_v8  ;;  %3269 = vmatpush3.bf16.msra.mxu1 %v3557_v7  ;;  %v3042_v7 = vcombine.high %v988_v4, %v992_v5  ;;  %v993_v8 = vld [vmem:[#allocation9 + $0x168] sm:$0xff] }
 0x124   :  { %3270 = vmatprep.subr.bf16.mxu1 %v3559_v9  ;;  %v3041_v9 = vcombine.low %v988_v4, %v992_v5  ;;  %v963_v4 = vld [vmem:[#allocation9 + $0x78] sm:$0xff] }
 0x126   :  { %3249 = vmatpush3.bf16.msra.mxu0 %v3560_v10  ;;  %v3043_v10 = vcombine.low %v989_v6, %v993_v8 }
 0x127   :  { %3250 = vmatprep.subr.bf16.mxu0 %v3562_v12  ;;  %3271 = vmatpush3.bf16.msra.mxu1 %v3561_v11  ;;  %v3044_v11 = vcombine.high %v989_v6, %v993_v8  ;;  %v996_v12 = vld [vmem:[#allocation9 + $0x180] sm:$0xff] }
 0x128   :  { %3272 = vmatprep.subr.bf16.mxu1 %v3563_v13  ;;  %v1000_v13 = vld [vmem:[#allocation9 + $0x1a0] sm:$0xff] }
 0x129   :  { %v3050_v15 = vcombine.high %v996_v12, %v1000_v13  ;;  %v3049_v20 = vcombine.low %v996_v12, %v1000_v13  ;;  %v971_v12 = vld [vmem:[#allocation9 + $0xb8] sm:$0xff] }
 0x12a   :  { %3251 = vmatpush3.bf16.msra.mxu0 %v3564_v14  ;;  %v997_v14 = vld [vmem:[#allocation9 + $0x188] sm:$0xff] }
 0x12b   :  { %3273 = vmatpush3.bf16.msra.mxu1 %v3565_v16  ;;  %1374 = vmatprep.subr.bf16.mxu0 %v3002_v31  ;;  %v1001_v16 = vld [vmem:[#allocation9 + $0x1a8] sm:$0xff]  ;;  %v3060_v31 = vcombine.high %v1005_v22, %v1009_v23 }
 0x12c   :  { %1415 = vmatprep.subr.bf16.mxu1 %v3004_v36  ;;  %v3051_v25 = vcombine.low %v997_v14, %v1001_v16 }
 0x12d   :  { %893 = vmatmul.mubr.bf16.vlgmr.msra.gmra.mrb[4].mxu0 %v264_v21  ;;  %v3052_v21 = vcombine.high %v997_v14, %v1001_v16 }
 0x12e   :  { %933 = vmatmul.mubr.bf16.vlgmr.msra.gmra.mrb[4].mxu1 %v266_v24  ;;  %1375 = vmatpush1.bf16.msra.mxu0 %v3001_v29  ;;  %v4307_v24 = vld [vmem:[#allocation9 + $0x10] sm:$0xff]  ;;  %v955_v29 = vld [vmem:[#allocation9 + $0x38] sm:$0xff] }
 0x12f   :  { %1416 = vmatpush1.bf16.msra.mxu1 %v3003_v35  ;;  %1376 = vmatprep.subr.bf16.mxu0 %v3010_v37  ;;  %v3005_v32 = vcombine.low %v4307_v24, %v954_v27  ;;  %v3007_v33 = vcombine.low %v951_v28, %v955_v29  ;;  %v3059_v35 = vcombine.low %v1005_v22, %v1009_v23 }
 0x130   :  { %1417 = vmatprep.subr.bf16.mxu1 %v3012_v41  ;;  %1406 = vmatprep.mubr.bf16.mxu0 %v4048_v19  ;;  %v3006_v36 = vcombine.high %v4307_v24, %v954_v27  ;;  %v3008_v37 = vcombine.high %v951_v28, %v955_v29  ;;  %v3030_v24 = vcombine.high %v974_v17, %v978_v18  ;;  %v986_v27 = vld [vmem:[#allocation9 + $0x130] sm:$0xff]  ;;  %v983_v28 = vld [vmem:[#allocation9 + $0x118] sm:$0xff] }
 0x131   :  { %1447 = vmatprep.mubr.bf16.mxu1 %v4048_v19  ;;  %v987_v29 = vld [vmem:[#allocation9 + $0x138] sm:$0xff] }
 0x132   :  { %1377 = vmatpush1.bf16.msra.mxu0 %v3009_v45 }
 0x133   :  { %1418 = vmatpush1.bf16.msra.mxu1 %v3011_v46  ;;  %1378 = vmatprep.subr.bf16.mxu0 %v3018_v47 }
 0x134   :  { %1419 = vmatprep.subr.bf16.mxu1 %v3020_v48 }
 0x136   :  { %1379 = vmatpush1.bf16.msra.mxu0 %v3017_v49 }
 0x137   :  { %1420 = vmatpush1.bf16.msra.mxu1 %v3019_v50  ;;  %1380 = vmatprep.subr.bf16.mxu0 %v3026_v54 }
 0x138   :  { %1421 = vmatprep.subr.bf16.mxu1 %v3028_v59 }
 0x13a   :  { %1381 = vmatpush1.bf16.msra.mxu0 %v3025_v57 }
 0x13b   :  { %1422 = vmatpush1.bf16.msra.mxu1 %v3027_v58  ;;  %1382 = vmatprep.subr.bf16.mxu0 %v3034_v63 }
 0x13c   :  { %1423 = vmatprep.subr.bf16.mxu1 %v3036_v3  ;;  %v959_v3 = vld [vmem:[#allocation9 + $0x58] sm:$0xff] }
 0x13d   :  { %v3016_v8 = vcombine.high %v959_v3, %v963_v4  ;;  %v3015_v14 = vcombine.low %v959_v3, %v963_v4  ;;  %v3574_v3 = vld [vmem:[#allocation12 + $0x20] ss:$12 sps:$4 sm:$0xff]  }
 0x13e   :  { %1383 = vmatpush1.bf16.msra.mxu0 %v3033_v1  ;;  %v962_v1 = vld [vmem:[#allocation9 + $0x70] sm:$0xff]  ;;  %v3577_v4 = vld [vmem:[#allocation12 + $0x34] ss:$12 sps:$4 sm:$0xff]  }
 0x13f   :  { %1424 = vmatpush1.bf16.msra.mxu1 %v3035_v2  ;;  %1384 = vmatprep.subr.bf16.mxu0 %v3042_v7  ;;  %v3014_v7 = vcombine.high %v958_v0, %v962_v1  ;;  %v3013_v13 = vcombine.low %v958_v0, %v962_v1  ;;  %v3570_v0 = vld [vmem:[#allocation12 + $0x8] ss:$12 sps:$4 sm:$0xff]  }
 0x140   :  { %1425 = vmatprep.subr.bf16.mxu1 %v3044_v11  ;;  %v967_v11 = vld [vmem:[#allocation9 + $0x98] sm:$0xff]  ;;  %v3573_v1 = vld [vmem:[#allocation12 + $0x1c] ss:$12 sps:$4 sm:$0xff]  }
 0x141   :  { %v3024_v16 = vcombine.high %v967_v11, %v971_v12  ;;  %v3023_v23 = vcombine.low %v967_v11, %v971_v12  ;;  %v3586_v11 = vld [vmem:[#allocation12 + $0x68] ss:$12 sps:$4 sm:$0xff]  }
 0x142   :  { %1385 = vmatpush1.bf16.msra.mxu0 %v3041_v9  ;;  %v966_v9 = vld [vmem:[#allocation9 + $0x90] sm:$0xff] }
 0x143   :  { %1426 = vmatpush1.bf16.msra.mxu1 %v3043_v10  ;;  %1386 = vmatprep.subr.bf16.mxu0 %v3050_v15  ;;  %v970_v10 = vld [vmem:[#allocation9 + $0xb0] sm:$0xff] }
 0x144   :  { %1427 = vmatprep.subr.bf16.mxu1 %v3052_v21  ;;  %v3022_v15 = vcombine.high %v966_v9, %v970_v10  ;;  %v979_v21 = vld [vmem:[#allocation9 + $0xf8] sm:$0xff]  ;;  %v3021_v22 = vcombine.low %v966_v9, %v970_v10  ;;  %v3583_v10 = vld [vmem:[#allocation12 + $0x60] ss:$12 sps:$4 sm:$0xff]   ;;  %v3589_v12 = vld [vmem:[#allocation12 + $0x7c] ss:$12 sps:$4 sm:$0xff]  }
 0x145   :  { %v3582_v9 = vld [vmem:[#allocation12 + $0x50] ss:$12 sps:$4 sm:$0xff]  }
 0x146   :  { %1387 = vmatpush1.bf16.msra.mxu0 %v3049_v20  ;;  %v975_v20 = vld [vmem:[#allocation9 + $0xd8] sm:$0xff] }
 0x147   :  { %1428 = vmatpush1.bf16.msra.mxu1 %v3051_v25  ;;  %1388 = vmatprep.subr.bf16.mxu0 %v3058_v26  ;;  %v3032_v25 = vcombine.high %v975_v20, %v979_v21  ;;  %v982_v26 = vld [vmem:[#allocation9 + $0x110] sm:$0xff] }
 0x148   :  { %1429 = vmatprep.subr.bf16.mxu1 %v3060_v31  ;;  %v3029_v31 = vcombine.low %v974_v17, %v978_v18  ;;  %v3594_v17 = vld [vmem:[#allocation12 + $0x98] ss:$12 sps:$4 sm:$0xff]  }
 0x149   :  { %v3597_v18 = vld [vmem:[#allocation12 + $0xac] ss:$12 sps:$4 sm:$0xff]  }
 0x14a   :  { %1389 = vmatpush1.bf16.msra.mxu0 %v3057_v34  ;;  %v3040_v34 = vcombine.high %v983_v28, %v987_v29 }
 0x14b   :  { %1430 = vmatpush1.bf16.msra.mxu1 %v3059_v35  ;;  %1456 = vmatprep.subr.bf16.mxu0 %v3006_v36  ;;  %v990_v35 = vld [vmem:[#allocation9 + $0x150] sm:$0xff] }
 0x14c   :  { %1497 = vmatprep.subr.bf16.mxu1 %v3008_v37  ;;  %v994_v36 = vld [vmem:[#allocation9 + $0x170] sm:$0xff]  ;;  %v991_v37 = vld [vmem:[#allocation9 + $0x158] sm:$0xff] }
 0x1e0   :  { %v3208_v38 = vpop.f32.mrb[0].mxu0 }
 0x1e1   :  { %v3209_v39 = vpop.f32.mrb[1].mxu0  ;;  %v3230_v40 = vpop.f32.mrb[0].mxu1 }
 0x1e2   :  { %v3210_v41 = vadd.f32 %v3209_v39, %v3208_v38  ;;  %v3211_v42 = vpop.f32.mrb[2].mxu0  ;;  %v3231_v43 = vpop.f32.mrb[1].mxu1  ;;  %v995_v38 = vld [vmem:[#allocation9 + $0x178] sm:$0xff]  ;;  %v3037_v39 = vcombine.low %v982_v26, %v986_v27 }
 0x1e3   :  { %v3212_v44 = vpop.f32.mrb[3].mxu0  ;;  %v3232_v45 = vadd.f32 %v3231_v43, %v3230_v40  ;;  %v3233_v46 = vpop.f32.mrb[2].mxu1  ;;  %v3039_v40 = vcombine.low %v983_v28, %v987_v29  ;;  %v3048_v42 = vcombine.high %v991_v37, %v995_v38  ;;  %v998_v43 = vld [vmem:[#allocation9 + $0x190] sm:$0xff] }
 0x1e4   :  { %v3234_v47 = vpop.f32.mrb[3].mxu1  ;;  %v1002_v44 = vld [vmem:[#allocation9 + $0x1b0] sm:$0xff]  ;;  %v1003_v46 = vld [vmem:[#allocation9 + $0x1b8] sm:$0xff] }
 0x1e5   :  { %v855_v48 = vadd.f32 %v3232_v45, %v3210_v41  ;;  %v3046_v41 = vcombine.high %v990_v35, %v994_v36  ;;  %v999_v45 = vld [vmem:[#allocation9 + $0x198] sm:$0xff]  ;;  %v3045_v47 = vcombine.low %v990_v35, %v994_v36  ;;  %v3609_v35 = vld [vmem:[#allocation15 + $0x58] sm:$0xff]  }
 0x1e6   :  { %v3603_v28 = vld [vmem:[#allocation15 + $0x48] sm:$0xff]   ;;  %v3610_v36 = vld [vmem:[#allocation15 + $0x18] sm:$0xff]  }
 0x1e7   :  { %v3604_v29 = vld [vmem:[#allocation15 + $0x8] sm:$0xff]  }
 0x200   :  { %v3252_v49 = vpop.f32.mrb[4].mxu0 }
 0x201   :  { %v3253_v50 = vpop.f32.mrb[5].mxu0  ;;  %v3274_v51 = vpop.f32.mrb[4].mxu1 }
 0x202   :  { %v3254_v52 = vadd.f32 %v3253_v50, %v3252_v49  ;;  %v3255_v53 = vpop.f32.mrb[6].mxu0  ;;  %v3275_v54 = vpop.f32.mrb[5].mxu1  ;;  %v3054_v49 = vcombine.high %v998_v43, %v1002_v44  ;;  %v3056_v50 = vcombine.high %v999_v45, %v1003_v46 }
 0x203   :  { %v3256_v55 = vpop.f32.mrb[7].mxu0  ;;  %v3276_v58 = vadd.f32 %v3275_v54, %v3274_v51  ;;  %v3277_v59 = vpop.f32.mrb[6].mxu1  ;;  %v1006_v51 = vld [vmem:[#allocation9 + $0x1d0] sm:$0xff]  ;;  %v1007_v53 = vld [vmem:[#allocation9 + $0x1d8] sm:$0xff] }
 0x204   :  { %v895_v57 = vadd.f32 %v3254_v52, %v855_v48  ;;  %v3278_v61 = vpop.f32.mrb[7].mxu1  ;;  %v3047_v48 = vcombine.low %v991_v37, %v995_v38  ;;  %v1010_v52 = vld [vmem:[#allocation9 + $0x1f0] sm:$0xff]  ;;  %v1011_v54 = vld [vmem:[#allocation9 + $0x1f8] sm:$0xff]  ;;  %v3053_v55 = vcombine.low %v998_v43, %v1002_v44 }
 0x205   :  { %v3064_v59 = vcombine.high %v1007_v53, %v1011_v54  ;;  %v3063_v61 = vcombine.low %v1007_v53, %v1011_v54  ;;  %v3611_v37 = vld [vmem:[#allocation15 + $0xa0] sm:$0xff]   ;;  %v3617_v43 = vld [vmem:[#allocation15 + $0xb0] sm:$0xff]  }
 0x206   :  { %v935_v62 = vadd.f32 %v3276_v58, %v895_v57  ;;  %v3055_v57 = vcombine.low %v999_v45, %v1003_v46  ;;  %v3062_v58 = vcombine.high %v1006_v51, %v1010_v52  ;;  %v3612_v38 = vld [vmem:[#allocation15 + $0x60] sm:$0xff]   ;;  %v3618_v44 = vld [vmem:[#allocation15 + $0x70] sm:$0xff]   ;;  %v3620_v46 = vld [vmem:[#allocation15 + $0xb8] sm:$0xff]  }
 0x207   :  { %v3619_v45 = vld [vmem:[#allocation15 + $0x30] sm:$0xff]  }
 0x208   :  { %v940_v63 = vadd.f32 %v935_v62, %v213_v60  ;;  %v3061_v60 = vcombine.low %v1006_v51, %v1010_v52  ;;  %v3569_v62 = vld [vmem:[#allocation12 + $0x4] ss:$12 sps:$4 sm:$0xff]   ;;  %v4343_v51 = vld [vmem:[#allocation11] sm:$0xff] }
 0x20a   :  { %941 = vst [vmem:[#allocation2] sm:$0x3] %v940_v63  ;;  %v3567_v63 = vld [vmem:[#allocation12] ss:$12 sps:$4 sm:$0xff]  }
 0x211   :  { %v945_v2 = vld [vmem:[#allocation2] sm:$0x3] }
 0x212   :  { %v946_v5 = vmul.f32 0.00390625, %v945_v2  ;;  %v3571_v2 = vld [vmem:[#allocation12 + $0x18] ss:$12 sps:$4 sm:$0xff]  }
 0x214   :  { %v4312_v6 = vpack.c.bf16 %v946_v5, %v946_v5  ;;  %v3575_v5 = vld [vmem:[#allocation12 + $0x30] ss:$12 sps:$4 sm:$0xff]  }
 0x216   :  { %1407 = vmatmul.mubr.bf16.vlgmr.msra.gmra.mrb[8].mxu0 %v4312_v6  ;;  %1448 = vmatmul.mubr.bf16.vlgmr.msra.gmra.mrb[8].mxu1 %v4312_v6 }
 0x217   :  { %1457 = vmatpush1.bf16.msra.mxu0 %v3005_v32  ;;  %1498 = vmatpush1.bf16.msra.mxu1 %v3007_v33  ;;  %v3031_v32 = vcombine.low %v975_v20, %v979_v21  ;;  %v3038_v33 = vcombine.high %v982_v26, %v986_v27  ;;  %v3595_v20 = vld [vmem:[#allocation12 + $0xa8] ss:$12 sps:$4 sm:$0xff]   ;;  %v3598_v21 = vld [vmem:[#allocation12 + $0xb0] ss:$12 sps:$4 sm:$0xff]  }
 0x218   :  { %1458 = vmatprep.subr.bf16.mxu0 %v3014_v7  ;;  %1499 = vmatprep.subr.bf16.mxu1 %v3016_v8  ;;  %v3578_v7 = vld [vmem:[#allocation12 + $0x38] ss:$12 sps:$4 sm:$0xff]   ;;  %v3579_v8 = vld [vmem:[#allocation12 + $0x48] ss:$12 sps:$4 sm:$0xff]   ;;  %v3602_v27 = vld [vmem:[#allocation15 + $0x88] sm:$0xff]  }
 0x219   :  { %1488 = vmatprep.mubr.bf16.mxu0 %v4048_v19  ;;  %1529 = vmatprep.mubr.bf16.mxu1 %v4048_v19  ;;  %v3601_v26 = vld [vmem:[#allocation15] sm:$0xff]  }
 0x21b   :  { %1459 = vmatpush1.bf16.msra.mxu0 %v3013_v13  ;;  %1500 = vmatpush1.bf16.msra.mxu1 %v3015_v14  ;;  %v3587_v13 = vld [vmem:[#allocation12 + $0x78] ss:$12 sps:$4 sm:$0xff]   ;;  %v3590_v14 = vld [vmem:[#allocation12 + $0x80] ss:$12 sps:$4 sm:$0xff]  }
 0x21c   :  { %1460 = vmatprep.subr.bf16.mxu0 %v3022_v15  ;;  %1501 = vmatprep.subr.bf16.mxu1 %v3024_v16  ;;  %v3593_v15 = vld [vmem:[#allocation12 + $0x94] ss:$12 sps:$4 sm:$0xff]   ;;  %v3591_v16 = vld [vmem:[#allocation12 + $0x90] ss:$12 sps:$4 sm:$0xff]  }
 0x21f   :  { %1461 = vmatpush1.bf16.msra.mxu0 %v3021_v22  ;;  %1502 = vmatpush1.bf16.msra.mxu1 %v3023_v23  ;;  %v1538_v22 = vld [vmem:[#allocation6] sm:$0x3] }
 0x220   :  { %1462 = vmatprep.subr.bf16.mxu0 %v3030_v24  ;;  %1503 = vmatprep.subr.bf16.mxu1 %v3032_v25  ;;  %v1539_v23 = vpack.c.bf16 %v1538_v22, %v1538_v22  ;;  %v3599_v24 = vld [vmem:[#allocation15 + $0x80] sm:$0xff]  }
 0x221   :  { %v3600_v25 = vld [vmem:[#allocation15 + $0x40] sm:$0xff]  }
 0x223   :  { %1463 = vmatpush1.bf16.msra.mxu0 %v3029_v31  ;;  %1504 = vmatpush1.bf16.msra.mxu1 %v3031_v32  ;;  %v3605_v31 = vld [vmem:[#allocation15 + $0x90] sm:$0xff]  }
 0x224   :  { %1464 = vmatprep.subr.bf16.mxu0 %v3038_v33  ;;  %1505 = vmatprep.subr.bf16.mxu1 %v3040_v34  ;;  %v3606_v32 = vld [vmem:[#allocation15 + $0x50] sm:$0xff]   ;;  %v3608_v34 = vld [vmem:[#allocation15 + $0x98] sm:$0xff]  }
 0x225   :  { %v3607_v33 = vld [vmem:[#allocation15 + $0x10] sm:$0xff]  }
 0x227   :  { %1465 = vmatpush1.bf16.msra.mxu0 %v3037_v39  ;;  %1506 = vmatpush1.bf16.msra.mxu1 %v3039_v40  ;;  %v3613_v39 = vld [vmem:[#allocation15 + $0x20] sm:$0xff]   ;;  %v3614_v40 = vld [vmem:[#allocation15 + $0xa8] sm:$0xff]  }
 0x228   :  { %1466 = vmatprep.subr.bf16.mxu0 %v3046_v41  ;;  %1507 = vmatprep.subr.bf16.mxu1 %v3048_v42  ;;  %v3615_v41 = vld [vmem:[#allocation15 + $0x68] sm:$0xff]  }
 0x229   :  { %v3616_v42 = vld [vmem:[#allocation15 + $0x28] sm:$0xff]  }
 0x22b   :  { %1467 = vmatpush1.bf16.msra.mxu0 %v3045_v47  ;;  %1508 = vmatpush1.bf16.msra.mxu1 %v3047_v48  ;;  %v3621_v47 = vld [vmem:[#allocation15 + $0x78] sm:$0xff]  }
 0x22c   :  { %1468 = vmatprep.subr.bf16.mxu0 %v3054_v49  ;;  %1509 = vmatprep.subr.bf16.mxu1 %v3056_v50  ;;  %v3622_v48 = vld [vmem:[#allocation15 + $0x38] sm:$0xff]   ;;  %v3623_v49 = vld [vmem:[#allocation18 + $0x40] sm:$0xff]   ;;  %v1024_v50 = vsub.s32 2, %v4296_v30 }
 0x22e   :  { %v1025_v52 = vrot.slane %v4343_v51, %v1024_v50 }
 0x22f   :  { %1469 = vmatpush1.bf16.msra.mxu0 %v3053_v55  ;;  %1510 = vmatpush1.bf16.msra.mxu1 %v3055_v57 }
 0x230   :  { %1470 = vmatprep.subr.bf16.mxu0 %v3062_v58  ;;  %1511 = vmatprep.subr.bf16.mxu1 %v3064_v59 }
 0x233   :  { %1471 = vmatpush1.bf16.msra.mxu0 %v3061_v60  ;;  %1512 = vmatpush1.bf16.msra.mxu1 %v3063_v61 }
 0x234   :  { %1717 = vmatprep.subr.bf16.mxu0 %v3569_v62  ;;  %3417 = vmatprep.subr.bf16.mxu1 %v4047_v56 }
 0x236   :  { %1489 = vmatmul.mubr.bf16.vlgmr.msra.gmra.mrb[12].mxu0 %v4312_v6  ;;  %1530 = vmatmul.mubr.bf16.vlgmr.msra.gmra.mrb[12].mxu1 %v4312_v6  ;;  %v3581_v6 = vld [vmem:[#allocation12 + $0x4c] ss:$12 sps:$4 sm:$0xff]  }
 0x237   :  { %1718 = vmatpush1.bf16.msra.mxu0 %v3567_v63  ;;  %3418 = vmatpush3.bf16.msra.mxu1 %v3570_v0 }
 0x238   :  { %1719 = vmatprep.subr.bf16.mxu0 %v3573_v1  ;;  %3419 = vmatprep.subr.bf16.mxu1 %v4047_v56 }
 0x239   :  { %1749 = vmatprep.mubr.bf16.mxu0 %v4048_v19  ;;  %3433 = vmatprep.mubr.msk.bf16.mxu1 %vm4049_vm0, %v4047_v56  ;;  %v3585_v19 = vld [vmem:[#allocation12 + $0x64] ss:$12 sps:$4 sm:$0xff]  }
 0x23b   :  { %1720 = vmatpush1.bf16.msra.mxu0 %v3571_v2  ;;  %3420 = vmatpush3.bf16.msra.mxu1 %v3574_v3 }
 0x23c   :  { %1721 = vmatprep.subr.bf16.mxu0 %v3577_v4  ;;  %3421 = vmatprep.subr.bf16.mxu1 %v4047_v56 }
 0x23f   :  { %1722 = vmatpush1.bf16.msra.mxu0 %v3575_v5  ;;  %3422 = vmatpush3.bf16.msra.mxu1 %v3578_v7 }
 0x240   :  { %1723 = vmatprep.subr.bf16.mxu0 %v3581_v6  ;;  %3423 = vmatprep.subr.bf16.mxu1 %v4047_v56  ;;  %v1572_v6 = vld [vmem:[#allocation14] sm:$0x7] }
 0x243   :  { %1724 = vmatpush1.bf16.msra.mxu0 %v3579_v8  ;;  %3424 = vmatpush3.bf16.msra.mxu1 %v3582_v9  ;;  %v1016_v8 = vsub.s32 0, %v4296_v30  ;;  %v1020_v9 = vsub.s32 1, %v4296_v30 }
 0x244   :  { %1725 = vmatprep.subr.bf16.mxu0 %v3585_v19  ;;  %3425 = vmatprep.subr.bf16.mxu1 %v4047_v56 }
 0x245   :  { %v1577_v19 = vrot.slane %v1572_v6, %v1016_v8 }
 0x247   :  { %1726 = vmatpush1.bf16.msra.mxu0 %v3583_v10  ;;  %3426 = vmatpush3.bf16.msra.mxu1 %v3586_v11  ;;  %v1585_v10 = vrot.slane %v1572_v6, %v1024_v50  ;;  %v1581_v11 = vrot.slane %v1572_v6, %v1020_v9  ;;  %v3634_v6 = vld [vmem:[#allocation18 + $0x28] sm:$0xff]  }
 0x248   :  { %1727 = vmatprep.subr.bf16.mxu0 %v3589_v12  ;;  %3427 = vmatprep.subr.bf16.mxu1 %v4047_v56 }
 0x24b   :  { %1728 = vmatpush1.bf16.msra.mxu0 %v3587_v13  ;;  %3428 = vmatpush3.bf16.msra.mxu1 %v3590_v14 }
 0x24c   :  { %1729 = vmatprep.subr.bf16.mxu0 %v3593_v15  ;;  %3429 = vmatprep.subr.bf16.mxu1 %v4047_v56 }
 0x24f   :  { %1730 = vmatpush1.bf16.msra.mxu0 %v3591_v16  ;;  %3430 = vmatpush3.bf16.msra.mxu1 %v3594_v17 }
 0x250   :  { %1731 = vmatprep.subr.bf16.mxu0 %v3597_v18  ;;  %3431 = vmatprep.subr.bf16.mxu1 %v4047_v56 }
 0x253   :  { %1732 = vmatpush1.bf16.msra.mxu0 %v3595_v20  ;;  %3432 = vmatpush3.bf16.msra.mxu1 %v3598_v21 }
 0x254   :  { %3437 = vmatprep.subr.bf16.mxu1 %v4047_v56  ;;  %3289 = vmatprep.subr.bf16.mxu0 %v3600_v25 }
 0x256   :  { %1750 = vmatmul.mubr.bf16.vlgmr.msra.gmra.mrb[16].mxu0 %v1539_v23  ;;  %3434 = vmatmul.mubr.bf16.vlgmr.msra.gmra.mrb[16].mxu1 %v1539_v23 }
 0x257   :  { %3453 = vmatprep.mubr.msk.bf16.mxu1 %vm4049_vm0, %v4047_v56  ;;  %3438 = vmatpush3.bf16.msra.mxu1 %v3599_v24 }
 0x258   :  { %3290 = vmatpush3.bf16.msra.mxu0 %v3601_v26  ;;  %3439 = vmatprep.subr.bf16.mxu1 %v4047_v56 }
 0x259   :  { %3291 = vmatprep.subr.bf16.mxu0 %v3603_v28 }
 0x25b   :  { %3440 = vmatpush3.bf16.msra.mxu1 %v3602_v27 }
 0x25c   :  { %3441 = vmatprep.subr.bf16.mxu1 %v4047_v56  ;;  %3292 = vmatpush3.bf16.msra.mxu0 %v3604_v29 }
 0x25d   :  { %3293 = vmatprep.subr.bf16.mxu0 %v3606_v32 }
 0x25f   :  { %3442 = vmatpush3.bf16.msra.mxu1 %v3605_v31 }
 0x260   :  { %3443 = vmatprep.subr.bf16.mxu1 %v4047_v56  ;;  %3294 = vmatpush3.bf16.msra.mxu0 %v3607_v33 }
 0x261   :  { %3295 = vmatprep.subr.bf16.mxu0 %v3609_v35 }
 0x263   :  { %3444 = vmatpush3.bf16.msra.mxu1 %v3608_v34 }
 0x264   :  { %3445 = vmatprep.subr.bf16.mxu1 %v4047_v56  ;;  %3296 = vmatpush3.bf16.msra.mxu0 %v3610_v36  ;;  %v1021_v36 = vrot.slane %v4343_v51, %v1020_v9  ;;  %v3635_v9 = vld [vmem:[#allocation18 + $0x70] sm:$0xff]  }
 0x265   :  { %3297 = vmatprep.subr.bf16.mxu0 %v3612_v38 }
 0x267   :  { %3446 = vmatpush3.bf16.msra.mxu1 %v3611_v37 }
 0x268   :  { %3447 = vmatprep.subr.bf16.mxu1 %v4047_v56  ;;  %3298 = vmatpush3.bf16.msra.mxu0 %v3613_v39 }
 0x269   :  { %3299 = vmatprep.subr.bf16.mxu0 %v3615_v41 }
 0x26b   :  { %3448 = vmatpush3.bf16.msra.mxu1 %v3614_v40 }
 0x26c   :  { %3449 = vmatprep.subr.bf16.mxu1 %v4047_v56  ;;  %3300 = vmatpush3.bf16.msra.mxu0 %v3616_v42 }
 0x26d   :  { %3301 = vmatprep.subr.bf16.mxu0 %v3618_v44 }
 0x26f   :  { %3450 = vmatpush3.bf16.msra.mxu1 %v3617_v43 }
 0x270   :  { %3451 = vmatprep.subr.bf16.mxu1 %v4047_v56  ;;  %3302 = vmatpush3.bf16.msra.mxu0 %v3619_v45 }
 0x271   :  { %3303 = vmatprep.subr.bf16.mxu0 %v3621_v47  ;;  %v3624_v47 = vld [vmem:[#allocation18] sm:$0xff]  }
 0x273   :  { %3452 = vmatpush3.bf16.msra.mxu1 %v3620_v46 }
 0x274   :  { %3304 = vmatpush3.bf16.msra.mxu0 %v3622_v48  ;;  %3329 = vmatprep.subr.bf16.mxu1 %v3623_v49 }
 0x275   :  { %3457 = vmatprep.subr.bf16.mxu0 %v4047_v56 }
 0x2e9   :  { %v4346_v53 = vpop.f32.mrb[8].mxu0  ;;  %v1449_v54 = vpop.f32.mrb[8].mxu1 }
 0x2ea   :  { %v4348_v55 = vadd.f32 %v1449_v54, %v1025_v52  ;;  %v1410_v57 = vpop.f32.mrb[9].mxu0  ;;  %v4350_v58 = vpop.f32.mrb[9].mxu1  ;;  %v3625_v52 = vld [vmem:[#allocation18 + $0x48] sm:$0xff]  }
 0x2eb   :  { %v1412_v59 = vpop.f32.mrb[10].mxu0  ;;  %v1453_v60 = vpop.f32.mrb[10].mxu1  ;;  %v1411_v43 = vadd.f32 %v1410_v57, %v1021_v36  ;;  %v3628_v57 = vld [vmem:[#allocation18 + $0x10] sm:$0xff]  }
 0x2ec   :  { %v1413_v61 = vpop.f32.mrb[11].mxu0  ;;  %v1454_v62 = vpop.f32.mrb[11].mxu1  ;;  %v3626_v60 = vld [vmem:[#allocation18 + $0x8] sm:$0xff]  }
 0x2ed   :  { %v2113_v54 = vpack.c.bf16 %v1411_v43, %v1411_v43  ;;  %v3627_v61 = vld [vmem:[#allocation18 + $0x50] sm:$0xff]   ;;  %v3629_v62 = vld [vmem:[#allocation18 + $0x58] sm:$0xff]  }
 0x2ee   :  { %v3661_v43 = vld [vmem:[#allocation20 + $0x30] sm:$0xff]  }
 0x309   :  { %v4352_v63 = vpop.f32.mrb[12].mxu0  ;;  %v4354_v0 = vpop.f32.mrb[12].mxu1 }
 0x30a   :  { %v4356_v1 = vpop.f32.mrb[13].mxu0  ;;  %v4358_v2 = vpop.f32.mrb[13].mxu1 }
 0x30b   :  { %v1494_v3 = vpop.f32.mrb[14].mxu0  ;;  %v1535_v4 = vpop.f32.mrb[14].mxu1 }
 0x30c   :  { %v1495_v5 = vpop.f32.mrb[15].mxu0  ;;  %v1536_v7 = vpop.f32.mrb[15].mxu1  ;;  %v3630_v3 = vld [vmem:[#allocation18 + $0x18] sm:$0xff]   ;;  %v3631_v4 = vld [vmem:[#allocation18 + $0x60] sm:$0xff]  }
 0x30d   :  { %v3632_v5 = vld [vmem:[#allocation18 + $0x20] sm:$0xff]   ;;  %v3633_v7 = vld [vmem:[#allocation18 + $0x68] sm:$0xff]  }
 0x329   :  { %v1751_v12 = vpop.f32.mrb[16].mxu0  ;;  %v1792_v13 = vpop.f32.mrb[16].mxu1 }
 0x32a   :  { %v1752_v14 = vadd.f32 %v1751_v12, %v1577_v19  ;;  %v1793_v15 = vadd.f32 %v1792_v13, %v1585_v10  ;;  %v1753_v16 = vpop.f32.mrb[17].mxu0  ;;  %v3435_v17 = vpop.f32.mrb[17].mxu1  ;;  %v1036_v19 = vsub.s32 5, %v4296_v30  ;;  %v3636_v10 = vld [vmem:[#allocation18 + $0x30] sm:$0xff]   ;;  %v3637_v12 = vld [vmem:[#allocation18 + $0x78] sm:$0xff]  }
 0x32b   :  { %v1754_v18 = vadd.f32 %v1753_v16, %v1581_v11  ;;  %v1755_v20 = vpop.f32.mrb[18].mxu0  ;;  %v1795_v21 = vpop.f32.mrb[18].mxu1  ;;  %v1017_v11 = vrot.slane %v4343_v51, %v1016_v8  ;;  %v3639_v16 = vld [vmem:[#allocation18 + $0x140] sm:$0xff]   ;;  %v3642_v8 = vld [vmem:[#allocation18 + $0x108] sm:$0xff]  }
 0x32c   :  { %v1801_v22 = vmin.f32 %v1752_v14, 0.0  ;;  %v1803_v23 = vmin.f32 %v1793_v15, 0.0  ;;  %v1756_v24 = vpop.f32.mrb[19].mxu0  ;;  %v3436_v25 = vpop.f32.mrb[19].mxu1  ;;  %vm1798_vm1 = vcmp.gt.f32.partialorder %v1752_v14, 0.0  ;;  %vm1800_vm2 = vcmp.gt.f32.partialorder %v1793_v15, 0.0 }
 0x32d   :  { %v1802_v26 = vmin.f32 %v1754_v18, 0.0  ;;  %vm1799_vm3 = vcmp.gt.f32.partialorder %v1754_v18, 0.0  ;;  %v1037_v13 = vrot.slane %v4343_v51, %v1036_v19  ;;  %v3641_v21 = vld [vmem:[#allocation18 + $0x148] sm:$0xff]   ;;  %v3644_v24 = vld [vmem:[#allocation18 + $0x110] sm:$0xff]   ;;  %v3646_v25 = vld [vmem:[#allocation18 + $0x118] sm:$0xff]  }
 0x32e   :  { %v1804_v27 = vmul.f32 1.442695, %v1801_v22  ;;  %v1808_v28 = vmul.f32 1.442695, %v1803_v23  ;;  %v3643_v23 = vld [vmem:[#allocation18 + $0x150] sm:$0xff]  }
 0x32f   :  { %v1806_v29 = vmul.f32 1.442695, %v1802_v26  ;;  %v1493_v17 = vadd.f32 %v4356_v1, %v1037_v13  ;;  %v3647_v1 = vld [vmem:[#allocation18 + $0x160] sm:$0xff]  }
 0x330   :  { %3695 = vpow2.f32 %v1804_v27  ;;  %v3648_v26 = vld [vmem:[#allocation18 + $0x120] sm:$0xff]   ;;  %v3649_v27 = vld [vmem:[#allocation18 + $0x168] sm:$0xff]  }
 0x331   :  { %3697 = vpow2.f32 %v1808_v28  ;;  %v2117_v22 = vpack.c.bf16 %v1493_v17, %v1493_v17  ;;  %v3650_v28 = vld [vmem:[#allocation18 + $0x128] sm:$0xff]  }
 0x332   :  { %3699 = vpow2.f32 %v1806_v29  ;;  %v1032_v29 = vsub.s32 4, %v4296_v30 }
 0x33a   :  { %v3696_v31 = vpop.eup %3695 }
 0x33b   :  { %v3698_v32 = vpop.eup %3697  ;;  %v3089_v33 = vadd.f32 -1.0, %v3696_v31  ;;  %v3651_v31 = vld [vmem:[#allocation18 + $0x170] sm:$0xff]  }
 0x33c   :  { %v3700_v34 = vpop.eup %3699  ;;  %v3091_v35 = vadd.f32 -1.0, %v3698_v32  ;;  %v3652_v32 = vld [vmem:[#allocation18 + $0x130] sm:$0xff]  }
 0x33d   :  { %v1813_v37 = vmul.f32 1.6732632, %v3089_v33  ;;  %v3090_v38 = vadd.f32 -1.0, %v3700_v34  ;;  %v1033_v33 = vrot.slane %v4343_v51, %v1032_v29  ;;  %v3653_v34 = vld [vmem:[#allocation18 + $0x178] sm:$0xff]   ;;  %v3676_v29 = vld [vmem:[#allocation18 + $0xb0] sm:$0xff]  }
 0x33e   :  { %v1815_v39 = vmul.f32 1.6732632, %v3091_v35  ;;  %v3654_v35 = vld [vmem:[#allocation18 + $0x138] sm:$0xff]  }
 0x33f   :  { %v1816_v40 = vsel %vm1798_vm1, %v1752_v14, %v1813_v37  ;;  %v1814_v41 = vmul.f32 1.6732632, %v3090_v38  ;;  %v3638_v14 = vld [vmem:[#allocation18 + $0x38] sm:$0xff]   ;;  %v1491_v36 = vadd.f32 %v4352_v63, %v1033_v33  ;;  %v3655_v38 = vld [vmem:[#allocation20] sm:$0xff]  }
 0x340   :  { %v1818_v42 = vsel %vm1800_vm2, %v1793_v15, %v1815_v39  ;;  %v1819_v44 = vmul.f32 1.050701, %v1816_v40  ;;  %v1409_v15 = vadd.f32 %v4346_v53, %v1017_v11  ;;  %v3645_v53 = vld [vmem:[#allocation18 + $0x158] sm:$0xff]   ;;  %v3656_v39 = vld [vmem:[#allocation20 + $0x8] sm:$0xff]   ;;  %v3657_v40 = vld [vmem:[#allocation20 + $0x10] sm:$0xff]  }
 0x341   :  { %v1821_v45 = vmul.f32 1.050701, %v1818_v42  ;;  %v1817_v46 = vsel %vm1799_vm3, %v1754_v18, %v1814_v41  ;;  %v3640_v18 = vld [vmem:[#allocation18 + $0x100] sm:$0xff]   ;;  %v2116_v37 = vpack.c.bf16 %v1491_v36, %v1491_v36  ;;  %v3658_v41 = vld [vmem:[#allocation20 + $0x18] sm:$0xff]   ;;  %v3660_v42 = vld [vmem:[#allocation20 + $0x28] sm:$0xff]  }
 0x342   :  { %v1820_v48 = vmul.f32 1.050701, %v1817_v46  ;;  %v1822_v59 = vpack.c.bf16 %v1819_v44, %v1819_v44  ;;  %v2112_v20 = vpack.c.bf16 %v1409_v15, %v1409_v15  ;;  %v3659_v63 = vld [vmem:[#allocation20 + $0x20] sm:$0xff]   ;;  %v3662_v44 = vld [vmem:[#allocation20 + $0x38] sm:$0xff]   ;;  %v3665_v15 = vld [vmem:[#allocation18 + $0xc8] sm:$0xff]  }
 0x343   :  { %v1824_v49 = vpack.c.bf16 %v1821_v45, %v1821_v45  ;;  %v3663_v45 = vld [vmem:[#allocation18 + $0xc0] sm:$0xff]   ;;  %v3678_v33 = vld [vmem:[#allocation18 + $0xb8] sm:$0xff]  }
 0x344   :  { %v1823_v50 = vpack.c.bf16 %v1820_v48, %v1820_v48  ;;  %v3680_v36 = vld [vmem:[#allocation18 + $0x180] sm:$0xff]  }
 0x345   :  { %3454 = vmatmul.mubr.bf16.vlgmr.msra.gmra.mrb[20].mxu1 %v1824_v49 }
 0x346   :  { %3330 = vmatpush3.bf16.msra.mxu1 %v3624_v47  ;;  %2056 = vmatprep.mubr.bf16.mxu0 %v1823_v50  ;;  %v3092_v50 = vld [vmem:[#allocation17] ss:$0 sm:$0xff] }
 0x347   :  { %2769 = vmatprep.mubr.bf16.mxu1 %v2113_v54  ;;  %2057 = vmatmul.mubr.bf16.vlgmr.msra.gmra.mrb[20].mxu0 %v1822_v59 }
 0x348   :  { %3331 = vmatprep.subr.bf16.mxu1 %v3625_v52  ;;  %3473 = vmatprep.mubr.msk.bf16.mxu0 %vm4049_vm0, %v4047_v56 }
 0x349   :  { %3458 = vmatpush3.bf16.msra.mxu0 %v3655_v38 }
 0x34a   :  { %3332 = vmatpush3.bf16.msra.mxu1 %v3626_v60  ;;  %3459 = vmatprep.subr.bf16.mxu0 %v4047_v56 }
 0x34b   :  { %3333 = vmatprep.subr.bf16.mxu1 %v3627_v61 }
 0x34d   :  { %3460 = vmatpush3.bf16.msra.mxu0 %v3656_v39  ;;  %v3681_v39 = vld [vmem:[#allocation18 + $0x1c8] sm:$0xff]  }
 0x34e   :  { %3334 = vmatpush3.bf16.msra.mxu1 %v3628_v57  ;;  %3461 = vmatprep.subr.bf16.mxu0 %v4047_v56 }
 0x34f   :  { %3335 = vmatprep.subr.bf16.mxu1 %v3629_v62 }
 0x351   :  { %3462 = vmatpush3.bf16.msra.mxu0 %v3657_v40 }
 0x352   :  { %3336 = vmatpush3.bf16.msra.mxu1 %v3630_v3  ;;  %3463 = vmatprep.subr.bf16.mxu0 %v4047_v56 }
 0x353   :  { %3337 = vmatprep.subr.bf16.mxu1 %v3631_v4 }
 0x355   :  { %3464 = vmatpush3.bf16.msra.mxu0 %v3658_v41 }
 0x356   :  { %3338 = vmatpush3.bf16.msra.mxu1 %v3632_v5  ;;  %3465 = vmatprep.subr.bf16.mxu0 %v4047_v56 }
 0x357   :  { %3339 = vmatprep.subr.bf16.mxu1 %v3633_v7 }
 0x359   :  { %3466 = vmatpush3.bf16.msra.mxu0 %v3659_v63 }
 0x35a   :  { %3340 = vmatpush3.bf16.msra.mxu1 %v3634_v6  ;;  %3467 = vmatprep.subr.bf16.mxu0 %v4047_v56 }
 0x35b   :  { %3341 = vmatprep.subr.bf16.mxu1 %v3635_v9 }
 0x35d   :  { %3468 = vmatpush3.bf16.msra.mxu0 %v3660_v42 }
 0x35e   :  { %3342 = vmatpush3.bf16.msra.mxu1 %v3636_v10  ;;  %3469 = vmatprep.subr.bf16.mxu0 %v4047_v56 }
 0x35f   :  { %3343 = vmatprep.subr.bf16.mxu1 %v3637_v12  ;;  %v3664_v12 = vld [vmem:[#allocation18 + $0x80] sm:$0xff]  }
 0x361   :  { %3470 = vmatpush3.bf16.msra.mxu0 %v3661_v43 }
 0x362   :  { %3344 = vmatpush3.bf16.msra.mxu1 %v3638_v14  ;;  %3471 = vmatprep.subr.bf16.mxu0 %v4047_v56  ;;  %v1028_v56 = vsub.s32 3, %v4296_v30 }
 0x363   :  { %3373 = vmatprep.subr.bf16.mxu1 %v3639_v16 }
 0x364   :  { %v1029_v7 = vrot.slane %v4343_v51, %v1028_v56 }
 0x365   :  { %2770 = vmatmul.mubr.bf16.vlgmr.msra.gmra.mrb[24].mxu1 %v2112_v20  ;;  %3472 = vmatpush3.bf16.msra.mxu0 %v3662_v44  ;;  %v3682_v44 = vld [vmem:[#allocation18 + $0x188] sm:$0xff]  }
 0x366   :  { %3374 = vmatpush3.bf16.msra.mxu1 %v3640_v18  ;;  %2849 = vmatprep.mubr.bf16.mxu1 %v2117_v22  ;;  %v1452_v19 = vadd.f32 %v4350_v58, %v1029_v7  ;;  %v3666_v22 = vld [vmem:[#allocation18 + $0x88] sm:$0xff]   ;;  %v3668_v58 = vld [vmem:[#allocation18 + $0x90] sm:$0xff]  }
 0x367   :  { %3375 = vmatprep.subr.bf16.mxu1 %v3641_v21  ;;  %3351 = vmatprep.subr.bf16.mxu0 %v3663_v45  ;;  %v3683_v45 = vld [vmem:[#allocation18 + $0x1d0] sm:$0xff]  }
 0x368   :  { %v2115_v16 = vpack.c.bf16 %v1452_v19, %v1452_v19 }
 0x36a   :  { %3376 = vmatpush3.bf16.msra.mxu1 %v3642_v8  ;;  %v3667_v8 = vld [vmem:[#allocation18 + $0xd0] sm:$0xff]  }
 0x36b   :  { %3377 = vmatprep.subr.bf16.mxu1 %v3643_v23  ;;  %v3669_v23 = vld [vmem:[#allocation18 + $0xd8] sm:$0xff]  }
 0x36e   :  { %3378 = vmatpush3.bf16.msra.mxu1 %v3644_v24  ;;  %v3670_v24 = vld [vmem:[#allocation18 + $0x98] sm:$0xff]  }
 0x36f   :  { %3379 = vmatprep.subr.bf16.mxu1 %v3645_v53  ;;  %v3671_v53 = vld [vmem:[#allocation18 + $0xe0] sm:$0xff]  }
 0x372   :  { %3380 = vmatpush3.bf16.msra.mxu1 %v3646_v25  ;;  %v3672_v25 = vld [vmem:[#allocation18 + $0xa0] sm:$0xff]  }
 0x373   :  { %3381 = vmatprep.subr.bf16.mxu1 %v3647_v1  ;;  %v3673_v1 = vld [vmem:[#allocation18 + $0xe8] sm:$0xff]  }
 0x376   :  { %3382 = vmatpush3.bf16.msra.mxu1 %v3648_v26  ;;  %v3674_v26 = vld [vmem:[#allocation18 + $0xa8] sm:$0xff]  }
 0x377   :  { %3383 = vmatprep.subr.bf16.mxu1 %v3649_v27  ;;  %v3675_v27 = vld [vmem:[#allocation18 + $0xf0] sm:$0xff]  }
 0x37a   :  { %3384 = vmatpush3.bf16.msra.mxu1 %v3650_v28  ;;  %v1044_v28 = vsub.s32 7, %v4296_v30 }
 0x37b   :  { %3385 = vmatprep.subr.bf16.mxu1 %v3651_v31  ;;  %v3677_v31 = vld [vmem:[#allocation18 + $0xf8] sm:$0xff]  }
 0x37e   :  { %3386 = vmatpush3.bf16.msra.mxu1 %v3652_v32  ;;  %v1045_v32 = vrot.slane %v4343_v51, %v1044_v28 }
 0x37f   :  { %3387 = vmatprep.subr.bf16.mxu1 %v3653_v34  ;;  %v3679_v34 = vld [vmem:[#allocation18 + $0x1c0] sm:$0xff]  }
 0x382   :  { %3388 = vmatpush3.bf16.msra.mxu1 %v3654_v35  ;;  %v1534_v35 = vadd.f32 %v4358_v2, %v1045_v32  ;;  %v3684_v2 = vld [vmem:[#allocation18 + $0x190] sm:$0xff]  }
 0x384   :  { %v2119_v40 = vpack.c.bf16 %v1534_v35, %v1534_v35 }
 0x385   :  { %2850 = vmatmul.mubr.bf16.vlgmr.msra.gmra.mrb[28].mxu1 %v2116_v37  ;;  %v2114_v37 = vpack.c.bf16 %v4348_v55, %v4348_v55  ;;  %v3686_v55 = vld [vmem:[#allocation18 + $0x198] sm:$0xff]  }
 0x418   :  { %v2098_v46 = vpop.f32.mrb[20].mxu1 }
 0x419   :  { %v3455_v47 = vpop.f32.mrb[21].mxu1 }
 0x41a   :  { %v3305_v48 = vpop.f32.mrb[20].mxu0  ;;  %v2101_v49 = vpop.f32.mrb[22].mxu1  ;;  %v3687_v47 = vld [vmem:[#allocation18 + $0x1e0] sm:$0xff]  }
 0x41b   :  { %v3306_v52 = vpop.f32.mrb[21].mxu0  ;;  %v3456_v54 = vpop.f32.mrb[23].mxu1  ;;  %v3689_v49 = vld [vmem:[#allocation18 + $0x1e8] sm:$0xff]  }
 0x41c   :  { %v3307_v59 = vadd.f32 %v3306_v52, %v3305_v48  ;;  %v3308_v60 = vpop.f32.mrb[22].mxu0  ;;  %v3688_v48 = vld [vmem:[#allocation18 + $0x1a0] sm:$0xff]   ;;  %v1040_v52 = vsub.s32 6, %v4296_v30  ;;  %v3691_v54 = vld [vmem:[#allocation18 + $0x1f0] sm:$0xff]  }
 0x41d   :  { %v3309_v61 = vpop.f32.mrb[23].mxu0 }
 0x41e   :  { %v2059_v57 = vadd.f32 %v3307_v59, %v3092_v50  ;;  %v3690_v50 = vld [vmem:[#allocation18 + $0x1a8] sm:$0xff]   ;;  %v3692_v59 = vld [vmem:[#allocation18 + $0x1b0] sm:$0xff]   ;;  %v1041_v60 = vrot.slane %v4343_v51, %v1040_v52  ;;  %v3693_v61 = vld [vmem:[#allocation18 + $0x1f8] sm:$0xff]  }
 0x420   :  { %v2099_v62 = vadd.f32 %v2098_v46, %v2059_v57  ;;  %v3685_v46 = vld [vmem:[#allocation18 + $0x1d8] sm:$0xff]  }
 0x421   :  { %v3694_v57 = vld [vmem:[#allocation18 + $0x1b8] sm:$0xff]  }
 0x422   :  { %v2105_v3 = vmin.f32 %v2099_v62, 0.0  ;;  %vm2104_vm4 = vcmp.gt.f32.partialorder %v2099_v62, 0.0 }
 0x424   :  { %v2106_v4 = vmul.f32 1.442695, %v2105_v3 }
 0x426   :  { %3701 = vpow2.f32 %v2106_v4 }
 0x430   :  { %v3702_v5 = vpop.eup %3701 }
 0x431   :  { %v3117_v6 = vadd.f32 -1.0, %v3702_v5 }
 0x433   :  { %v2109_v9 = vmul.f32 1.6732632, %v3117_v6 }
 0x435   :  { %v2110_v10 = vsel %vm2104_vm4, %v2099_v62, %v2109_v9  ;;  %v1532_v62 = vadd.f32 %v4354_v0, %v1041_v60 }
 0x436   :  { %v2111_v11 = vmul.f32 1.050701, %v2110_v10 }
 0x437   :  { %v2118_v3 = vpack.c.bf16 %v1532_v62, %v1532_v62 }
 0x438   :  { %v3345_v13 = vpop.f32.mrb[24].mxu1  ;;  %v2248_v14 = vpack.c.bf16 %v2111_v11, %v2111_v11 }
 0x439   :  { %v3346_v17 = vpop.f32.mrb[25].mxu1 }
 0x43a   :  { %v4387_v18 = vadd.f32 %v3346_v17, %v3345_v13  ;;  %v3348_v20 = vpop.f32.mrb[26].mxu1  ;;  %3474 = vmatmul.mubr.bf16.vlgmr.msra.gmra.mrb[24].mxu0 %v2248_v14 }
 0x43b   :  { %v3349_v21 = vpop.f32.mrb[27].mxu1  ;;  %3352 = vmatpush3.bf16.msra.mxu0 %v3664_v12  ;;  %2809 = vmatprep.mubr.bf16.mxu0 %v2115_v16  ;;  %v3190_v16 = vld [vmem:[#allocation21] ss:$0 sm:$0xff] }
 0x43c   :  { %3353 = vmatprep.subr.bf16.mxu0 %v3665_v15 }
 0x43f   :  { %3354 = vmatpush3.bf16.msra.mxu0 %v3666_v22  ;;  %v3191_v22 = vld [vmem:[#allocation23] ss:$0 sm:$0xff] }
 0x440   :  { %3355 = vmatprep.subr.bf16.mxu0 %v3667_v8 }
 0x443   :  { %3356 = vmatpush3.bf16.msra.mxu0 %v3668_v58 }
 0x444   :  { %3357 = vmatprep.subr.bf16.mxu0 %v3669_v23 }
 0x447   :  { %3358 = vmatpush3.bf16.msra.mxu0 %v3670_v24 }
 0x448   :  { %3359 = vmatprep.subr.bf16.mxu0 %v3671_v53 }
 0x44b   :  { %3360 = vmatpush3.bf16.msra.mxu0 %v3672_v25 }
 0x44c   :  { %3361 = vmatprep.subr.bf16.mxu0 %v3673_v1 }
 0x44f   :  { %3362 = vmatpush3.bf16.msra.mxu0 %v3674_v26 }
 0x450   :  { %3363 = vmatprep.subr.bf16.mxu0 %v3675_v27 }
 0x453   :  { %3364 = vmatpush3.bf16.msra.mxu0 %v3676_v29 }
 0x454   :  { %3365 = vmatprep.subr.bf16.mxu0 %v3677_v31 }
 0x457   :  { %3366 = vmatpush3.bf16.msra.mxu0 %v3678_v33 }
 0x458   :  { %v3389_v38 = vpop.f32.mrb[28].mxu1  ;;  %3395 = vmatprep.subr.bf16.mxu0 %v3679_v34 }
 0x459   :  { %v3390_v41 = vpop.f32.mrb[29].mxu1 }
 0x45a   :  { %v3391_v63 = vadd.f32 %v3390_v41, %v3389_v38  ;;  %2810 = vmatmul.mubr.bf16.vlgmr.msra.gmra.mrb[28].mxu0 %v2114_v37  ;;  %v3392_v42 = vpop.f32.mrb[30].mxu1 }
 0x45b   :  { %v3393_v43 = vpop.f32.mrb[31].mxu1  ;;  %3396 = vmatpush3.bf16.msra.mxu0 %v3680_v36  ;;  %2889 = vmatprep.mubr.bf16.mxu0 %v2119_v40 }
 0x45c   :  { %3397 = vmatprep.subr.bf16.mxu0 %v3681_v39 }
 0x45f   :  { %3398 = vmatpush3.bf16.msra.mxu0 %v3682_v44 }
 0x460   :  { %3399 = vmatprep.subr.bf16.mxu0 %v3683_v45 }
 0x463   :  { %3400 = vmatpush3.bf16.msra.mxu0 %v3684_v2 }
 0x464   :  { %3401 = vmatprep.subr.bf16.mxu0 %v3685_v46 }
 0x467   :  { %3402 = vmatpush3.bf16.msra.mxu0 %v3686_v55 }
 0x468   :  { %3403 = vmatprep.subr.bf16.mxu0 %v3687_v47 }
 0x46b   :  { %3404 = vmatpush3.bf16.msra.mxu0 %v3688_v48 }
 0x46c   :  { %3405 = vmatprep.subr.bf16.mxu0 %v3689_v49 }
 0x46f   :  { %3406 = vmatpush3.bf16.msra.mxu0 %v3690_v50 }
 0x470   :  { %3407 = vmatprep.subr.bf16.mxu0 %v3691_v54 }
 0x473   :  { %3408 = vmatpush3.bf16.msra.mxu0 %v3692_v59 }
 0x474   :  { %3409 = vmatprep.subr.bf16.mxu0 %v3693_v61 }
 0x477   :  { %3410 = vmatpush3.bf16.msra.mxu0 %v3694_v57 }
 0x47a   :  { %2890 = vmatmul.mubr.bf16.vlgmr.msra.gmra.mrb[32].mxu0 %v2118_v3 }
 0x50d   :  { %v2347_v4 = vpop.f32.mrb[24].mxu0 }
 0x50e   :  { %v2772_v56 = vadd.f32 %v4387_v18, %v2347_v4  ;;  %v3475_v30 = vpop.f32.mrb[25].mxu0 }
 0x50f   :  { %v2350_v5 = vpop.f32.mrb[26].mxu0 }
 0x510   :  { %v3476_v7 = vpop.f32.mrb[27].mxu0 }
 0x52d   :  { %v3367_v6 = vpop.f32.mrb[28].mxu0 }
 0x52e   :  { %v3368_v9 = vpop.f32.mrb[29].mxu0 }
 0x52f   :  { %v3369_v19 = vadd.f32 %v3368_v9, %v3367_v6  ;;  %v3370_v51 = vpop.f32.mrb[30].mxu0 }
 0x530   :  { %v3371_v10 = vpop.f32.mrb[31].mxu0 }
 0x531   :  { %v2812_v11 = vadd.f32 %v3369_v19, %v2772_v56 }
 0x533   :  { %v2852_v12 = vadd.f32 %v3391_v63, %v2812_v11 }
 0x54d   :  { %v3411_v13 = vpop.f32.mrb[32].mxu0 }
 0x54e   :  { %v3412_v14 = vpop.f32.mrb[33].mxu0 }
 0x54f   :  { %v3413_v0 = vadd.f32 %v3412_v14, %v3411_v13  ;;  %v3414_v15 = vpop.f32.mrb[34].mxu0 }
 0x550   :  { %v3415_v17 = vpop.f32.mrb[35].mxu0 }
 0x551   :  { %v2892_v20 = vadd.f32 %v3413_v0, %v2852_v12 }
 0x553   :  { %v2904_v21 = vadd.f32 %v3190_v16, %v2892_v20 }
 0x555   :  { %v2906_v18 = vmin.f32 %v2904_v21, 0.0 }
 0x557   :  { %v2913_v8 = vmul.f32 %v3191_v22, %v2906_v18 }
 0x559   :  { %v2914_v58 = vsub.f32 %v2904_v21, %v2913_v8 }
 0x55b   :  { %2915 = vst [vmem:[#allocation24] sm:$0x3] %v2914_v58 }
 0x55c   :  { %4000 = shalt.err (!%p3997_p10)
}
 0x55d   :  { %s4001_s27 = scalar_lea.hbm %s4423_s13, 32 }
 0x55e   :  { %p4002_p11 = scmp.ne.s32.totalorder %s4423_s13, %s4001_s27  ;;  %p4005_p12 = scmp.lt.u32.totalorder %s4001_s27, %s4423_s13 }
 0x560   :  { %p4007_p13 = pnand %p4005_p12, %p4002_p11 }
 0x562   :  { %4010 = shalt.err (!%p4007_p13)
}
 0x563   :  { %2925 = dma.vmem_to_hbm [thread:$0]  %s2923_s24, 32, %s4423_s13, [#allocation5]  }
 0x564   :  { %4025 = dma.done.wait [#allocation5], 32  }
 0x565   :  { %4026 = vsyncadd [#allocation5], 4294967264 }
 0x566   :  { %2929 = vsyncpa [#allocation4], 1 }
 0x567   :  { %2930 = vsyncpa [#allocation7], 1 }
 0x568   :  { %2931 = vsyncpa [#allocation10], 1 }
 0x569   :  { %2932 = vsyncpa [#allocation13], 1 }
 0x56a   :  { %2933 = vsyncpa [#allocation16], 1 }
 0x56b   :  { %2934 = vsyncpa [#allocation19], 1 }
 0x56c   :  { %2935 = vsyncpa [#allocation22], 1 }
 0x56d   :  { %2936 = vsyncpa [#allocation5], 1 }

</bundles_post_ra>
